<compile_context>
chip_gen: v6e
topology: v6e:2x2x1
jax: 0.10.0
libtpu: 0.0.40
codegen_flags: <defaults>
</compile_context>

<pallas_src>
import functools
import math

import jax
import jax.numpy as jnp
from jax.experimental import pallas as pl
from jax.experimental.pallas import tpu as pltpu


def _layernorm(v, g, b, eps=1e-5):
    mu = jnp.mean(v, axis=-1, keepdims=True)
    var = jnp.mean((v - mu) ** 2, axis=-1, keepdims=True)
    return (v - mu) * jax.lax.rsqrt(var + eps) * g + b


def _gelu_exact(x):
    # PyTorch nn.GELU() default = exact (erf) GELU (VPU polynomial).
    return 0.5 * x * (1.0 + jax.lax.erf(x * jnp.float32(1.0 / math.sqrt(2.0))))


def _gelu_tanh(x):
    # tanh-approx GELU: moves the transcendental onto the EUP slot (v6e/v7x).
    c = jnp.float32(math.sqrt(2.0 / math.pi))
    return 0.5 * x * (1.0 + jnp.tanh(c * (x + jnp.float32(0.044715) * (x * x * x))))


def block_kernel(x_ref, ln1g_ref, ln1b_ref,
                 wqkv_ref, projw_ref, projb_ref,
                 ln2g_ref, ln2b_ref, fc1w_ref, fc1b_ref, fc2w_ref, fc2b_ref,
                 out_ref, *, num_heads, use_tanh_gelu):
    Bt, N, C = x_ref.shape
    n_groups, _, three_g = wqkv_ref.shape
    G = three_g // 3
    hd = C // num_heads
    g = G // hd
    R = Bt * N

    # Flatten the batch block to rows (leading-dim merge only -> no relayout).
    x = x_ref[...].reshape(R, C)                       # (R, C) f32

    # ---- attention branch ----
    xn = _layernorm(x, ln1g_ref[...], ln1b_ref[...])   # f32
    xnb = xn.astype(jnp.bfloat16)

    attn_proj = None
    for gi in range(n_groups):                         # 1-4 groups (not nh) iterations
        # Fused per-group QKV GEMM: output width 3*G (>=384 lanes at ViT-B/L),
        # so the MXU N dimension is full instead of 64-wide per-head pushes.
        qkv_g = jnp.dot(xnb, wqkv_ref[gi],
                        preferred_element_type=jnp.float32)            # (R, 3G) f32

        ctx_heads = []
        for h in range(g):                             # static, small
            lo = h * hd
            q3 = qkv_g[:, lo:lo + hd].reshape(Bt, N, hd).astype(jnp.bfloat16)
            k3 = qkv_g[:, G + lo:G + lo + hd].reshape(Bt, N, hd).astype(jnp.bfloat16)
            v3 = qkv_g[:, 2 * G + lo:2 * G + lo + hd].reshape(Bt, N, hd).astype(jnp.bfloat16)

            # scale already folded into the q-part of wqkv at prep time
            s = jnp.einsum("bqd,bkd->bqk", q3, k3,
                           preferred_element_type=jnp.float32)          # (Bt, N, N)
            m = jnp.max(s, axis=-1, keepdims=True)
            p = jnp.exp(s - m)
            attn = p * pl.reciprocal(jnp.sum(p, axis=-1, keepdims=True), approx=True)
            ctx = jnp.einsum("bqk,bkd->bqd", attn.astype(jnp.bfloat16), v3,
                             preferred_element_type=jnp.float32)        # (Bt, N, hd)
            ctx_heads.append(ctx)

        # Group-wide context (R, G): output projection contracts over K = G
        # (128/256) instead of K = hd = 64.
        ctx_g = ctx_heads[0] if g == 1 else jnp.concatenate(ctx_heads, axis=-1)
        ctx_g = ctx_g.reshape(R, G).astype(jnp.bfloat16)
        contrib = jnp.dot(ctx_g, projw_ref[gi],
                          preferred_element_type=jnp.float32)           # (R, C)
        attn_proj = contrib if attn_proj is None else attn_proj + contrib

    x1 = x + attn_proj + projb_ref[...]                # first residual (+ proj bias)

    # ---- MLP branch ----
    # (For ViT-L+ on v7x the hidden dim H should be tiled here; see header note.)
    xn2 = _layernorm(x1, ln2g_ref[...], ln2b_ref[...])
    h1 = jnp.dot(xn2.astype(jnp.bfloat16), fc1w_ref[...],
                 preferred_element_type=jnp.float32) + fc1b_ref[...]
    h1 = _gelu_tanh(h1) if use_tanh_gelu else _gelu_exact(h1)
    h2 = jnp.dot(h1.astype(jnp.bfloat16), fc2w_ref[...],
                 preferred_element_type=jnp.float32) + fc2b_ref[...]

    out_ref[...] = (x1 + h2).reshape(Bt, N, C).astype(out_ref.dtype)


def _choose_batch_block(B, N, target_rows=1024):
    """Largest divisor Bt of B with Bt*N <= target_rows, preferring >=2 grid
    steps (megacore / v7x dual-TC sharding) and R = Bt*N a multiple of 8."""
    divisors = [d for d in range(1, B + 1) if B % d == 0]
    fitting = [d for d in divisors if d * N <= target_rows] or [1]
    multi = [d for d in fitting if B // d >= 2]        # keep both TCs busy
    cand = multi or fitting
    aligned = [d for d in cand if (d * N) % 8 == 0]    # sublane-aligned rows
    return max(aligned or cand)


def _choose_head_group(num_heads, head_dim, target_width=256):
    """Group heads so the fused QKV GEMM output / proj contraction is >=128
    (ideally 256) lanes wide; group size must divide num_heads."""
    divisors = [d for d in range(1, num_heads + 1) if num_heads % d == 0]
    fit = [d for d in divisors if d * head_dim <= target_width]
    g = max(fit) if fit else 1
    if g * head_dim < 128:
        bigger = [d for d in divisors if d * head_dim >= 128]
        if bigger:
            g = min(bigger)
    return g


def _prepare_kernel_params(params, num_heads, group_size):
    """Host-side weight re-layout + bf16 cast:
       - per group of `group_size` heads, q|k|v weights fused into (C, 3*G) with
         the attention scale folded into the q part  -> (n_groups, C, 3*G),
       - proj weight split into per-group (G, C) slabs -> (n_groups, G, C),
       - matmul weights bf16, LayerNorm params and biases f32."""
    C = params["proj_w"].shape[0]
    hd = C // num_heads
    n_groups = num_heads // group_size
    G = group_size * hd
    scale = float(hd) ** -0.5

    qkv_w = params["qkv_w"].astype(jnp.float32)        # (C, 3C): [q | k | v]
    wq = (qkv_w[:, :C] * scale).reshape(C, n_groups, G)
    wk = qkv_w[:, C:2 * C].reshape(C, n_groups, G)
    wv = qkv_w[:, 2 * C:].reshape(C, n_groups, G)
    wqkv = jnp.transpose(jnp.concatenate([wq, wk, wv], axis=-1), (1, 0, 2))  # (ng, C, 3G)

    return {
        "ln1_g": params["ln1_g"].astype(jnp.float32),
        "ln1_b": params["ln1_b"].astype(jnp.float32),
        "wqkv": wqkv.astype(jnp.bfloat16),
        "proj_w": params["proj_w"].astype(jnp.bfloat16).reshape(n_groups, G, C),
        "proj_b": params["proj_b"].astype(jnp.float32),
        "ln2_g": params["ln2_g"].astype(jnp.float32),
        "ln2_b": params["ln2_b"].astype(jnp.float32),
        "fc1_w": params["fc1_w"].astype(jnp.bfloat16),
        "fc1_b": params["fc1_b"].astype(jnp.float32),
        "fc2_w": params["fc2_w"].astype(jnp.bfloat16),
        "fc2_b": params["fc2_b"].astype(jnp.float32),
    }


def vit_block_pallas(x, params, num_heads, batch_block=None, use_tanh_gelu=True):
    B, N, C = x.shape
    assert C % num_heads == 0
    hd = C // num_heads
    H = params["fc1_w"].shape[1]

    Bt = batch_block if batch_block is not None else _choose_batch_block(B, N)
    assert B % Bt == 0, "batch block must divide B"
    grid = (B // Bt,)
    R = Bt * N

    g = _choose_head_group(num_heads, hd)
    n_groups = num_heads // g
    G = g * hd

    kp = _prepare_kernel_params(params, num_heads, g)
    args = (x,
            kp["ln1_g"], kp["ln1_b"],
            kp["wqkv"], kp["proj_w"], kp["proj_b"],
            kp["ln2_g"], kp["ln2_b"],
            kp["fc1_w"], kp["fc1_b"], kp["fc2_w"], kp["fc2_b"])

    # Physical VMEM ceiling (64 MiB/TC on v7x, 128 MiB on v5e/v6e).
    try:
        phys_vmem = int(pltpu.get_tpu_info().vmem_capacity_bytes)
    except Exception:
        phys_vmem = 64 << 20
    vmem_cap = max(32 << 20, phys_vmem - (8 << 20))

    param_bytes = sum(int(a.size) * a.dtype.itemsize for a in args[1:])
    io_bytes = 2 * Bt * N * C * 4                 # x block + out block (f32)
    interm_bytes = 4 * (2 * R * H                 # h1 f32 (+ bf16-copy headroom)
                        + R * 3 * G               # fused per-group QKV activations
                        + 3 * Bt * N * N          # scores / exp / attn
                        + 6 * R * C)              # xn, attn_proj, x1, xn2, h2, temp

    kernel = functools.partial(block_kernel, num_heads=num_heads,
                               use_tanh_gelu=use_tanh_gelu)

    def build(single_buffer_weights):
        def w_spec(shape):
            zeros = (0,) * len(shape)
            kwargs = {}
            if single_buffer_weights:
                # Constant index map -> one resident copy suffices (halves weight VMEM).
                kwargs["pipeline_mode"] = pl.Buffered(1)
            return pl.BlockSpec(shape, lambda i, _z=zeros: _z, **kwargs)

        in_specs = [
            pl.BlockSpec((Bt, N, C), lambda i: (i, 0, 0)),   # x block (double-buffered)
            w_spec((1, C)), w_spec((1, C)),                  # ln1 gamma / beta
            w_spec((n_groups, C, 3 * G)),                    # fused per-group QKV weight
            w_spec((n_groups, G, C)),                        # proj weight (per-group slab)
            w_spec((1, C)),                                  # proj bias
            w_spec((1, C)), w_spec((1, C)),                  # ln2 gamma / beta
            w_spec((C, H)), w_spec((1, H)),                  # fc1 weight / bias
            w_spec((H, C)), w_spec((1, C)),                  # fc2 weight / bias
        ]

        weight_bufs = 1 if single_buffer_weights else 2
        vmem_needed = (2 * io_bytes + weight_bufs * param_bytes
                       + interm_bytes + (8 << 20))
        vmem_limit = max(32 << 20, min(int(vmem_needed), vmem_cap))

        return pl.pallas_call(
            kernel,
            out_shape=jax.ShapeDtypeStruct((B, N, C), jnp.float32),
            grid_spec=pltpu.PrefetchScalarGridSpec(
                num_scalar_prefetch=0,
                grid=grid,
                in_specs=in_specs,
                out_specs=pl.BlockSpec((Bt, N, C), lambda i: (i, 0, 0)),
            ),
            compiler_params=pltpu.CompilerParams(
                dimension_semantics=("parallel",),
                vmem_limit_bytes=vmem_limit,
            ),
        )

    try:
        out = build(True)(*args)
        return jax.block_until_ready(out)
    except Exception:
        # pl.Buffered(1) single-buffering unsupported on this JAX/Mosaic version:
        # fall back to default double-buffered weights (previously validated config).
        return build(False)(*args)


def vit_block_ref(x, params, num_heads):
    """Pure-JAX f32 reference mirroring the PyTorch forward pass (exact erf GELU)."""
    B, N, C = x.shape
    hd = C // num_heads
    scale = hd ** (-0.5)

    def ln(v, g, b):
        mu = jnp.mean(v, axis=-1, keepdims=True)
        var = jnp.mean((v - mu) ** 2, axis=-1, keepdims=True)
        return (v - mu) / jnp.sqrt(var + 1e-5) * g + b

    xn = ln(x, params["ln1_g"][0], params["ln1_b"][0])
    qkv = xn @ params["qkv_w"]                                    # (B, N, 3C)
    qkv = qkv.reshape(B, N, 3, num_heads, hd).transpose(2, 0, 3, 1, 4)
    q, k, v = qkv[0], qkv[1], qkv[2]                              # (B, nh, N, hd)
    attn = jnp.einsum("bhqd,bhkd->bhqk", q, k) * scale
    attn = jax.nn.softmax(attn, axis=-1)
    ao = jnp.einsum("bhqk,bhkd->bhqd", attn, v)                   # (B, nh, N, hd)
    ao = ao.transpose(0, 2, 1, 3).reshape(B, N, C)
    ao = ao @ params["proj_w"] + params["proj_b"][0]
    x1 = x + ao

    xn2 = ln(x1, params["ln2_g"][0], params["ln2_b"][0])
    h1 = xn2 @ params["fc1_w"] + params["fc1_b"][0]
    h1 = 0.5 * h1 * (1.0 + jax.lax.erf(h1 / jnp.sqrt(2.0)))
    h2 = h1 @ params["fc2_w"] + params["fc2_b"][0]
    return x1 + h2


def init_params(key, dim, num_heads, mlp_ratio=4.0):
    hidden = int(dim * mlp_ratio)
    ks = jax.random.split(key, 6)
    s = 0.02
    return {
        "ln1_g": jnp.ones((1, dim), jnp.float32),
        "ln1_b": jnp.zeros((1, dim), jnp.float32),
        "qkv_w": (s * jax.random.normal(ks[0], (dim, 3 * dim))).astype(jnp.float32),
        "proj_w": (s * jax.random.normal(ks[1], (dim, dim))).astype(jnp.float32),
        "proj_b": (s * jax.random.normal(ks[2], (1, dim))).astype(jnp.float32),
        "ln2_g": jnp.ones((1, dim), jnp.float32),
        "ln2_b": jnp.zeros((1, dim), jnp.float32),
        "fc1_w": (s * jax.random.normal(ks[3], (dim, hidden))).astype(jnp.float32),
        "fc1_b": (s * jax.random.normal(ks[4], (1, hidden))).astype(jnp.float32),
        "fc2_w": (s * jax.random.normal(ks[5], (hidden, dim))).astype(jnp.float32),
        "fc2_b": jnp.zeros((1, dim), jnp.float32),
    }


if __name__ == "__main__":
    B, N, C = 2, 8, 32
    NUM_HEADS = 4

    key = jax.random.PRNGKey(0)
    kx, kp = jax.random.split(key)
    x = jax.random.normal(kx, (B, N, C), dtype=jnp.float32)
    params = init_params(kp, C, NUM_HEADS)

    out = vit_block_pallas(x, params, NUM_HEADS)
    out = jax.block_until_ready(out)

    ref = vit_block_ref(x, params, NUM_HEADS)
    assert out.shape == (B, N, C)
    # bf16 matmul operands + approx softmax reciprocal + tanh-GELU -> loosened tol.
    err = float(jnp.max(jnp.abs(out - ref)))
    assert jnp.allclose(out, ref, atol=2e-2, rtol=2e-2), err

    print("KERNEL_OK")
</pallas_src>

<mosaic_0001>
module attributes {stable_mosaic.version = 11 : i64} {
  func.func @block_kernel(%arg0: i32, %arg1: memref<1x8x32xf32, #tpu.memory_space<vmem>>, %arg2: memref<1x32xf32, #tpu.memory_space<vmem>>, %arg3: memref<1x32xf32, #tpu.memory_space<vmem>>, %arg4: memref<1x32x96xbf16, #tpu.memory_space<vmem>>, %arg5: memref<1x32x32xbf16, #tpu.memory_space<vmem>>, %arg6: memref<1x32xf32, #tpu.memory_space<vmem>>, %arg7: memref<1x32xf32, #tpu.memory_space<vmem>>, %arg8: memref<1x32xf32, #tpu.memory_space<vmem>>, %arg9: memref<32x128xbf16, #tpu.memory_space<vmem>>, %arg10: memref<1x128xf32, #tpu.memory_space<vmem>>, %arg11: memref<128x32xbf16, #tpu.memory_space<vmem>>, %arg12: memref<1x32xf32, #tpu.memory_space<vmem>>, %arg13: memref<1x8x32xf32, #tpu.memory_space<vmem>>) attributes {dimension_semantics = [#tpu.dimension_semantics<parallel>], iteration_bounds = array<i64: 2>, scalar_prefetch = 0 : i64, scratch_operands = 0 : i64, tpu.core_type = #tpu.core_type<tc>, window_params = [{transform_indices = @transform_0, window_bounds = array<i64: 1, 8, 32>}, {pipeline_mode = #tpu.pipeline_mode<synchronous>, transform_indices = @transform_1, window_bounds = array<i64: 1, 32>}, {pipeline_mode = #tpu.pipeline_mode<synchronous>, transform_indices = @transform_2, window_bounds = array<i64: 1, 32>}, {pipeline_mode = #tpu.pipeline_mode<synchronous>, transform_indices = @transform_3, window_bounds = array<i64: 1, 32, 96>}, {pipeline_mode = #tpu.pipeline_mode<synchronous>, transform_indices = @transform_4, window_bounds = array<i64: 1, 32, 32>}, {pipeline_mode = #tpu.pipeline_mode<synchronous>, transform_indices = @transform_5, window_bounds = array<i64: 1, 32>}, {pipeline_mode = #tpu.pipeline_mode<synchronous>, transform_indices = @transform_6, window_bounds = array<i64: 1, 32>}, {pipeline_mode = #tpu.pipeline_mode<synchronous>, transform_indices = @transform_7, window_bounds = array<i64: 1, 32>}, {pipeline_mode = #tpu.pipeline_mode<synchronous>, transform_indices = @transform_8, window_bounds = array<i64: 32, 128>}, {pipeline_mode = #tpu.pipeline_mode<synchronous>, transform_indices = @transform_9, window_bounds = array<i64: 1, 128>}, {pipeline_mode = #tpu.pipeline_mode<synchronous>, transform_indices = @transform_10, window_bounds = array<i64: 128, 32>}, {pipeline_mode = #tpu.pipeline_mode<synchronous>, transform_indices = @transform_11, window_bounds = array<i64: 1, 32>}, {transform_indices = @transform_12, window_bounds = array<i64: 1, 8, 32>}]} {
    %c0 = arith.constant 0 : index
    %c0_0 = arith.constant 0 : index
    %c0_1 = arith.constant 0 : index
    %0 = vector.load %arg1[%c0, %c0_0, %c0_1] : memref<1x8x32xf32, #tpu.memory_space<vmem>>, vector<1x8x32xf32>
    %1 = vector.shape_cast %0 : vector<1x8x32xf32> to vector<8x32xf32>
    %c0_2 = arith.constant 0 : index
    %c0_3 = arith.constant 0 : index
    %2 = vector.load %arg2[%c0_2, %c0_3] : memref<1x32xf32, #tpu.memory_space<vmem>>, vector<1x32xf32>
    %c0_4 = arith.constant 0 : index
    %c0_5 = arith.constant 0 : index
    %3 = vector.load %arg3[%c0_4, %c0_5] : memref<1x32xf32, #tpu.memory_space<vmem>>, vector<1x32xf32>
    %cst = arith.constant dense<0.000000e+00> : vector<8xf32>
    %4 = vector.multi_reduction <add>, %1, %cst [1] : vector<8x32xf32> to vector<8xf32>
    %5 = vector.shape_cast %4 : vector<8xf32> to vector<8x1xf32>
    %cst_6 = arith.constant 3.200000e+01 : f32
    %6 = vector.broadcast %cst_6 : f32 to vector<8x1xf32>
    %7 = arith.divf %5, %6 : vector<8x1xf32>
    %8 = vector.broadcast %7 : vector<8x1xf32> to vector<8x32xf32>
    %9 = arith.subf %1, %8 : vector<8x32xf32>
    %10 = arith.mulf %9, %9 : vector<8x32xf32>
    %cst_7 = arith.constant dense<0.000000e+00> : vector<8xf32>
    %11 = vector.multi_reduction <add>, %10, %cst_7 [1] : vector<8x32xf32> to vector<8xf32>
    %12 = vector.shape_cast %11 : vector<8xf32> to vector<8x1xf32>
    %cst_8 = arith.constant 3.200000e+01 : f32
    %13 = vector.broadcast %cst_8 : f32 to vector<8x1xf32>
    %14 = arith.divf %12, %13 : vector<8x1xf32>
    %15 = vector.broadcast %7 : vector<8x1xf32> to vector<8x32xf32>
    %16 = arith.subf %1, %15 : vector<8x32xf32>
    %cst_9 = arith.constant 9.99999974E-6 : f32
    %17 = vector.broadcast %cst_9 : f32 to vector<8x1xf32>
    %18 = arith.addf %14, %17 : vector<8x1xf32>
    %19 = math.rsqrt %18 : vector<8x1xf32>
    %20 = vector.broadcast %19 : vector<8x1xf32> to vector<8x32xf32>
    %21 = arith.mulf %16, %20 : vector<8x32xf32>
    %22 = vector.broadcast %2 : vector<1x32xf32> to vector<8x32xf32>
    %23 = arith.mulf %21, %22 : vector<8x32xf32>
    %24 = vector.broadcast %3 : vector<1x32xf32> to vector<8x32xf32>
    %25 = arith.addf %23, %24 : vector<8x32xf32>
    %26 = arith.truncf %25 : vector<8x32xf32> to vector<8x32xbf16>
    %c0_10 = arith.constant 0 : index
    %c0_11 = arith.constant 0 : index
    %c0_12 = arith.constant 0 : index
    %27 = vector.load %arg4[%c0_10, %c0_11, %c0_12] : memref<1x32x96xbf16, #tpu.memory_space<vmem>>, vector<1x32x96xbf16>
    %28 = vector.shape_cast %27 : vector<1x32x96xbf16> to vector<32x96xbf16>
    %cst_13 = arith.constant dense<0.000000e+00> : vector<8x96xf32>
    %29 = tpu.matmul %26, %28, %cst_13 {dimension_numbers = #tpu.dot_dimension_numbers<[1], [0], [0], [1], [0, 0, 1, 1], [], []>} : vector<8x32xbf16>, vector<32x96xbf16>, vector<8x96xf32> -> vector<8x96xf32>
    %30 = vector.extract_strided_slice %29 {offsets = [0, 0], sizes = [8, 8], strides = [1, 1]} : vector<8x96xf32> to vector<8x8xf32>
    %31 = vector.shape_cast %30 : vector<8x8xf32> to vector<1x8x8xf32>
    %32 = arith.truncf %31 : vector<1x8x8xf32> to vector<1x8x8xbf16>
    %33 = vector.extract_strided_slice %29 {offsets = [0, 32], sizes = [8, 8], strides = [1, 1]} : vector<8x96xf32> to vector<8x8xf32>
    %34 = vector.shape_cast %33 : vector<8x8xf32> to vector<1x8x8xf32>
    %35 = arith.truncf %34 : vector<1x8x8xf32> to vector<1x8x8xbf16>
    %36 = vector.extract_strided_slice %29 {offsets = [0, 64], sizes = [8, 8], strides = [1, 1]} : vector<8x96xf32> to vector<8x8xf32>
    %37 = vector.shape_cast %36 : vector<8x8xf32> to vector<1x8x8xf32>
    %38 = arith.truncf %37 : vector<1x8x8xf32> to vector<1x8x8xbf16>
    "tpu.trace_start"() <{level = 10 : i32, message = "bqd,bkd->bqk"}> : () -> ()
    %cst_14 = arith.constant dense<0.000000e+00> : vector<1x8x8xf32>
    %39 = tpu.matmul %32, %35, %cst_14 {dimension_numbers = #tpu.dot_dimension_numbers<[2], [2], [1], [1], [0, 0, 0, 1, 1, 1], [0], [0]>} : vector<1x8x8xbf16>, vector<1x8x8xbf16>, vector<1x8x8xf32> -> vector<1x8x8xf32>
    "tpu.trace_stop"() : () -> ()
    %cst_15 = arith.constant dense<0xFF800000> : vector<1x8xf32>
    %40 = vector.multi_reduction <maximumf>, %39, %cst_15 [2] : vector<1x8x8xf32> to vector<1x8xf32>
    %41 = vector.shape_cast %40 : vector<1x8xf32> to vector<1x8x1xf32>
    %42 = vector.broadcast %41 : vector<1x8x1xf32> to vector<1x8x8xf32>
    %43 = arith.subf %39, %42 : vector<1x8x8xf32>
    %44 = math.exp %43 : vector<1x8x8xf32>
    %cst_16 = arith.constant dense<0.000000e+00> : vector<1x8xf32>
    %45 = vector.multi_reduction <add>, %44, %cst_16 [2] : vector<1x8x8xf32> to vector<1x8xf32>
    %46 = vector.shape_cast %45 : vector<1x8xf32> to vector<1x8x1xf32>
    %47 = tpu.reciprocal %46 {approx = true} : vector<1x8x1xf32> -> vector<1x8x1xf32>
    %48 = vector.broadcast %47 : vector<1x8x1xf32> to vector<1x8x8xf32>
    %49 = arith.mulf %44, %48 : vector<1x8x8xf32>
    %50 = arith.truncf %49 : vector<1x8x8xf32> to vector<1x8x8xbf16>
    "tpu.trace_start"() <{level = 10 : i32, message = "bqk,bkd->bqd"}> : () -> ()
    %cst_17 = arith.constant dense<0.000000e+00> : vector<1x8x8xf32>
    %51 = tpu.matmul %50, %38, %cst_17 {dimension_numbers = #tpu.dot_dimension_numbers<[2], [1], [1], [2], [0, 0, 0, 1, 1, 2], [0], [0]>} : vector<1x8x8xbf16>, vector<1x8x8xbf16>, vector<1x8x8xf32> -> vector<1x8x8xf32>
    "tpu.trace_stop"() : () -> ()
    %52 = vector.extract_strided_slice %29 {offsets = [0, 8], sizes = [8, 8], strides = [1, 1]} : vector<8x96xf32> to vector<8x8xf32>
    %53 = vector.shape_cast %52 : vector<8x8xf32> to vector<1x8x8xf32>
    %54 = arith.truncf %53 : vector<1x8x8xf32> to vector<1x8x8xbf16>
    %55 = vector.extract_strided_slice %29 {offsets = [0, 40], sizes = [8, 8], strides = [1, 1]} : vector<8x96xf32> to vector<8x8xf32>
    %56 = vector.shape_cast %55 : vector<8x8xf32> to vector<1x8x8xf32>
    %57 = arith.truncf %56 : vector<1x8x8xf32> to vector<1x8x8xbf16>
    %58 = vector.extract_strided_slice %29 {offsets = [0, 72], sizes = [8, 8], strides = [1, 1]} : vector<8x96xf32> to vector<8x8xf32>
    %59 = vector.shape_cast %58 : vector<8x8xf32> to vector<1x8x8xf32>
    %60 = arith.truncf %59 : vector<1x8x8xf32> to vector<1x8x8xbf16>
    "tpu.trace_start"() <{level = 10 : i32, message = "bqd,bkd->bqk"}> : () -> ()
    %cst_18 = arith.constant dense<0.000000e+00> : vector<1x8x8xf32>
    %61 = tpu.matmul %54, %57, %cst_18 {dimension_numbers = #tpu.dot_dimension_numbers<[2], [2], [1], [1], [0, 0, 0, 1, 1, 1], [0], [0]>} : vector<1x8x8xbf16>, vector<1x8x8xbf16>, vector<1x8x8xf32> -> vector<1x8x8xf32>
    "tpu.trace_stop"() : () -> ()
    %cst_19 = arith.constant dense<0xFF800000> : vector<1x8xf32>
    %62 = vector.multi_reduction <maximumf>, %61, %cst_19 [2] : vector<1x8x8xf32> to vector<1x8xf32>
    %63 = vector.shape_cast %62 : vector<1x8xf32> to vector<1x8x1xf32>
    %64 = vector.broadcast %63 : vector<1x8x1xf32> to vector<1x8x8xf32>
    %65 = arith.subf %61, %64 : vector<1x8x8xf32>
    %66 = math.exp %65 : vector<1x8x8xf32>
    %cst_20 = arith.constant dense<0.000000e+00> : vector<1x8xf32>
    %67 = vector.multi_reduction <add>, %66, %cst_20 [2] : vector<1x8x8xf32> to vector<1x8xf32>
    %68 = vector.shape_cast %67 : vector<1x8xf32> to vector<1x8x1xf32>
    %69 = tpu.reciprocal %68 {approx = true} : vector<1x8x1xf32> -> vector<1x8x1xf32>
    %70 = vector.broadcast %69 : vector<1x8x1xf32> to vector<1x8x8xf32>
    %71 = arith.mulf %66, %70 : vector<1x8x8xf32>
    %72 = arith.truncf %71 : vector<1x8x8xf32> to vector<1x8x8xbf16>
    "tpu.trace_start"() <{level = 10 : i32, message = "bqk,bkd->bqd"}> : () -> ()
    %cst_21 = arith.constant dense<0.000000e+00> : vector<1x8x8xf32>
    %73 = tpu.matmul %72, %60, %cst_21 {dimension_numbers = #tpu.dot_dimension_numbers<[2], [1], [1], [2], [0, 0, 0, 1, 1, 2], [0], [0]>} : vector<1x8x8xbf16>, vector<1x8x8xbf16>, vector<1x8x8xf32> -> vector<1x8x8xf32>
    "tpu.trace_stop"() : () -> ()
    %74 = vector.extract_strided_slice %29 {offsets = [0, 16], sizes = [8, 8], strides = [1, 1]} : vector<8x96xf32> to vector<8x8xf32>
    %75 = vector.shape_cast %74 : vector<8x8xf32> to vector<1x8x8xf32>
    %76 = arith.truncf %75 : vector<1x8x8xf32> to vector<1x8x8xbf16>
    %77 = vector.extract_strided_slice %29 {offsets = [0, 48], sizes = [8, 8], strides = [1, 1]} : vector<8x96xf32> to vector<8x8xf32>
    %78 = vector.shape_cast %77 : vector<8x8xf32> to vector<1x8x8xf32>
    %79 = arith.truncf %78 : vector<1x8x8xf32> to vector<1x8x8xbf16>
    %80 = vector.extract_strided_slice %29 {offsets = [0, 80], sizes = [8, 8], strides = [1, 1]} : vector<8x96xf32> to vector<8x8xf32>
    %81 = vector.shape_cast %80 : vector<8x8xf32> to vector<1x8x8xf32>
    %82 = arith.truncf %81 : vector<1x8x8xf32> to vector<1x8x8xbf16>
    "tpu.trace_start"() <{level = 10 : i32, message = "bqd,bkd->bqk"}> : () -> ()
    %cst_22 = arith.constant dense<0.000000e+00> : vector<1x8x8xf32>
    %83 = tpu.matmul %76, %79, %cst_22 {dimension_numbers = #tpu.dot_dimension_numbers<[2], [2], [1], [1], [0, 0, 0, 1, 1, 1], [0], [0]>} : vector<1x8x8xbf16>, vector<1x8x8xbf16>, vector<1x8x8xf32> -> vector<1x8x8xf32>
    "tpu.trace_stop"() : () -> ()
    %cst_23 = arith.constant dense<0xFF800000> : vector<1x8xf32>
    %84 = vector.multi_reduction <maximumf>, %83, %cst_23 [2] : vector<1x8x8xf32> to vector<1x8xf32>
    %85 = vector.shape_cast %84 : vector<1x8xf32> to vector<1x8x1xf32>
    %86 = vector.broadcast %85 : vector<1x8x1xf32> to vector<1x8x8xf32>
    %87 = arith.subf %83, %86 : vector<1x8x8xf32>
    %88 = math.exp %87 : vector<1x8x8xf32>
    %cst_24 = arith.constant dense<0.000000e+00> : vector<1x8xf32>
    %89 = vector.multi_reduction <add>, %88, %cst_24 [2] : vector<1x8x8xf32> to vector<1x8xf32>
    %90 = vector.shape_cast %89 : vector<1x8xf32> to vector<1x8x1xf32>
    %91 = tpu.reciprocal %90 {approx = true} : vector<1x8x1xf32> -> vector<1x8x1xf32>
    %92 = vector.broadcast %91 : vector<1x8x1xf32> to vector<1x8x8xf32>
    %93 = arith.mulf %88, %92 : vector<1x8x8xf32>
    %94 = arith.truncf %93 : vector<1x8x8xf32> to vector<1x8x8xbf16>
    "tpu.trace_start"() <{level = 10 : i32, message = "bqk,bkd->bqd"}> : () -> ()
    %cst_25 = arith.constant dense<0.000000e+00> : vector<1x8x8xf32>
    %95 = tpu.matmul %94, %82, %cst_25 {dimension_numbers = #tpu.dot_dimension_numbers<[2], [1], [1], [2], [0, 0, 0, 1, 1, 2], [0], [0]>} : vector<1x8x8xbf16>, vector<1x8x8xbf16>, vector<1x8x8xf32> -> vector<1x8x8xf32>
    "tpu.trace_stop"() : () -> ()
    %96 = vector.extract_strided_slice %29 {offsets = [0, 24], sizes = [8, 8], strides = [1, 1]} : vector<8x96xf32> to vector<8x8xf32>
    %97 = vector.shape_cast %96 : vector<8x8xf32> to vector<1x8x8xf32>
    %98 = arith.truncf %97 : vector<1x8x8xf32> to vector<1x8x8xbf16>
    %99 = vector.extract_strided_slice %29 {offsets = [0, 56], sizes = [8, 8], strides = [1, 1]} : vector<8x96xf32> to vector<8x8xf32>
    %100 = vector.shape_cast %99 : vector<8x8xf32> to vector<1x8x8xf32>
    %101 = arith.truncf %100 : vector<1x8x8xf32> to vector<1x8x8xbf16>
    %102 = vector.extract_strided_slice %29 {offsets = [0, 88], sizes = [8, 8], strides = [1, 1]} : vector<8x96xf32> to vector<8x8xf32>
    %103 = vector.shape_cast %102 : vector<8x8xf32> to vector<1x8x8xf32>
    %104 = arith.truncf %103 : vector<1x8x8xf32> to vector<1x8x8xbf16>
    "tpu.trace_start"() <{level = 10 : i32, message = "bqd,bkd->bqk"}> : () -> ()
    %cst_26 = arith.constant dense<0.000000e+00> : vector<1x8x8xf32>
    %105 = tpu.matmul %98, %101, %cst_26 {dimension_numbers = #tpu.dot_dimension_numbers<[2], [2], [1], [1], [0, 0, 0, 1, 1, 1], [0], [0]>} : vector<1x8x8xbf16>, vector<1x8x8xbf16>, vector<1x8x8xf32> -> vector<1x8x8xf32>
    "tpu.trace_stop"() : () -> ()
    %cst_27 = arith.constant dense<0xFF800000> : vector<1x8xf32>
    %106 = vector.multi_reduction <maximumf>, %105, %cst_27 [2] : vector<1x8x8xf32> to vector<1x8xf32>
    %107 = vector.shape_cast %106 : vector<1x8xf32> to vector<1x8x1xf32>
    %108 = vector.broadcast %107 : vector<1x8x1xf32> to vector<1x8x8xf32>
    %109 = arith.subf %105, %108 : vector<1x8x8xf32>
    %110 = math.exp %109 : vector<1x8x8xf32>
    %cst_28 = arith.constant dense<0.000000e+00> : vector<1x8xf32>
    %111 = vector.multi_reduction <add>, %110, %cst_28 [2] : vector<1x8x8xf32> to vector<1x8xf32>
    %112 = vector.shape_cast %111 : vector<1x8xf32> to vector<1x8x1xf32>
    %113 = tpu.reciprocal %112 {approx = true} : vector<1x8x1xf32> -> vector<1x8x1xf32>
    %114 = vector.broadcast %113 : vector<1x8x1xf32> to vector<1x8x8xf32>
    %115 = arith.mulf %110, %114 : vector<1x8x8xf32>
    %116 = arith.truncf %115 : vector<1x8x8xf32> to vector<1x8x8xbf16>
    "tpu.trace_start"() <{level = 10 : i32, message = "bqk,bkd->bqd"}> : () -> ()
    %cst_29 = arith.constant dense<0.000000e+00> : vector<1x8x8xf32>
    %117 = tpu.matmul %116, %104, %cst_29 {dimension_numbers = #tpu.dot_dimension_numbers<[2], [1], [1], [2], [0, 0, 0, 1, 1, 2], [0], [0]>} : vector<1x8x8xbf16>, vector<1x8x8xbf16>, vector<1x8x8xf32> -> vector<1x8x8xf32>
    "tpu.trace_stop"() : () -> ()
    %118 = tpu.concatenate %51, %73, %95, %117 in 2 : vector<1x8x8xf32>, vector<1x8x8xf32>, vector<1x8x8xf32>, vector<1x8x8xf32> -> vector<1x8x32xf32>
    %119 = vector.shape_cast %118 : vector<1x8x32xf32> to vector<8x32xf32>
    %120 = arith.truncf %119 : vector<8x32xf32> to vector<8x32xbf16>
    %c0_30 = arith.constant 0 : index
    %c0_31 = arith.constant 0 : index
    %c0_32 = arith.constant 0 : index
    %121 = vector.load %arg5[%c0_30, %c0_31, %c0_32] : memref<1x32x32xbf16, #tpu.memory_space<vmem>>, vector<1x32x32xbf16>
    %122 = vector.shape_cast %121 : vector<1x32x32xbf16> to vector<32x32xbf16>
    %cst_33 = arith.constant dense<0.000000e+00> : vector<8x32xf32>
    %123 = tpu.matmul %120, %122, %cst_33 {dimension_numbers = #tpu.dot_dimension_numbers<[1], [0], [0], [1], [0, 0, 1, 1], [], []>} : vector<8x32xbf16>, vector<32x32xbf16>, vector<8x32xf32> -> vector<8x32xf32>
    %124 = arith.addf %1, %123 : vector<8x32xf32>
    %c0_34 = arith.constant 0 : index
    %c0_35 = arith.constant 0 : index
    %125 = vector.load %arg6[%c0_34, %c0_35] : memref<1x32xf32, #tpu.memory_space<vmem>>, vector<1x32xf32>
    %126 = vector.broadcast %125 : vector<1x32xf32> to vector<8x32xf32>
    %127 = arith.addf %124, %126 : vector<8x32xf32>
    %c0_36 = arith.constant 0 : index
    %c0_37 = arith.constant 0 : index
    %128 = vector.load %arg7[%c0_36, %c0_37] : memref<1x32xf32, #tpu.memory_space<vmem>>, vector<1x32xf32>
    %c0_38 = arith.constant 0 : index
    %c0_39 = arith.constant 0 : index
    %129 = vector.load %arg8[%c0_38, %c0_39] : memref<1x32xf32, #tpu.memory_space<vmem>>, vector<1x32xf32>
    %cst_40 = arith.constant dense<0.000000e+00> : vector<8xf32>
    %130 = vector.multi_reduction <add>, %127, %cst_40 [1] : vector<8x32xf32> to vector<8xf32>
    %131 = vector.shape_cast %130 : vector<8xf32> to vector<8x1xf32>
    %cst_41 = arith.constant 3.200000e+01 : f32
    %132 = vector.broadcast %cst_41 : f32 to vector<8x1xf32>
    %133 = arith.divf %131, %132 : vector<8x1xf32>
    %134 = vector.broadcast %133 : vector<8x1xf32> to vector<8x32xf32>
    %135 = arith.subf %127, %134 : vector<8x32xf32>
    %136 = arith.mulf %135, %135 : vector<8x32xf32>
    %cst_42 = arith.constant dense<0.000000e+00> : vector<8xf32>
    %137 = vector.multi_reduction <add>, %136, %cst_42 [1] : vector<8x32xf32> to vector<8xf32>
    %138 = vector.shape_cast %137 : vector<8xf32> to vector<8x1xf32>
    %cst_43 = arith.constant 3.200000e+01 : f32
    %139 = vector.broadcast %cst_43 : f32 to vector<8x1xf32>
    %140 = arith.divf %138, %139 : vector<8x1xf32>
    %141 = vector.broadcast %133 : vector<8x1xf32> to vector<8x32xf32>
    %142 = arith.subf %127, %141 : vector<8x32xf32>
    %cst_44 = arith.constant 9.99999974E-6 : f32
    %143 = vector.broadcast %cst_44 : f32 to vector<8x1xf32>
    %144 = arith.addf %140, %143 : vector<8x1xf32>
    %145 = math.rsqrt %144 : vector<8x1xf32>
    %146 = vector.broadcast %145 : vector<8x1xf32> to vector<8x32xf32>
    %147 = arith.mulf %142, %146 : vector<8x32xf32>
    %148 = vector.broadcast %128 : vector<1x32xf32> to vector<8x32xf32>
    %149 = arith.mulf %147, %148 : vector<8x32xf32>
    %150 = vector.broadcast %129 : vector<1x32xf32> to vector<8x32xf32>
    %151 = arith.addf %149, %150 : vector<8x32xf32>
    %152 = arith.truncf %151 : vector<8x32xf32> to vector<8x32xbf16>
    %c0_45 = arith.constant 0 : index
    %c0_46 = arith.constant 0 : index
    %153 = vector.load %arg9[%c0_45, %c0_46] : memref<32x128xbf16, #tpu.memory_space<vmem>>, vector<32x128xbf16>
    %cst_47 = arith.constant dense<0.000000e+00> : vector<8x128xf32>
    %154 = tpu.matmul %152, %153, %cst_47 {dimension_numbers = #tpu.dot_dimension_numbers<[1], [0], [0], [1], [0, 0, 1, 1], [], []>} : vector<8x32xbf16>, vector<32x128xbf16>, vector<8x128xf32> -> vector<8x128xf32>
    %c0_48 = arith.constant 0 : index
    %c0_49 = arith.constant 0 : index
    %155 = vector.load %arg10[%c0_48, %c0_49] : memref<1x128xf32, #tpu.memory_space<vmem>>, vector<1x128xf32>
    %156 = vector.broadcast %155 : vector<1x128xf32> to vector<8x128xf32>
    %157 = arith.addf %154, %156 : vector<8x128xf32>
    %cst_50 = arith.constant 5.000000e-01 : f32
    %158 = vector.broadcast %cst_50 : f32 to vector<8x128xf32>
    %159 = arith.mulf %158, %157 : vector<8x128xf32>
    %160 = arith.mulf %157, %157 : vector<8x128xf32>
    %161 = arith.mulf %160, %157 : vector<8x128xf32>
    %cst_51 = arith.constant 4.471500e-02 : f32
    %162 = vector.broadcast %cst_51 : f32 to vector<8x128xf32>
    %163 = arith.mulf %162, %161 : vector<8x128xf32>
    %164 = arith.addf %157, %163 : vector<8x128xf32>
    %cst_52 = arith.constant 0.797884583 : f32
    %165 = vector.broadcast %cst_52 : f32 to vector<8x128xf32>
    %166 = arith.mulf %165, %164 : vector<8x128xf32>
    %167 = math.tanh %166 : vector<8x128xf32>
    %cst_53 = arith.constant 1.000000e+00 : f32
    %168 = vector.broadcast %cst_53 : f32 to vector<8x128xf32>
    %169 = arith.addf %168, %167 : vector<8x128xf32>
    %170 = arith.mulf %159, %169 : vector<8x128xf32>
    %171 = arith.truncf %170 : vector<8x128xf32> to vector<8x128xbf16>
    %c0_54 = arith.constant 0 : index
    %c0_55 = arith.constant 0 : index
    %172 = vector.load %arg11[%c0_54, %c0_55] : memref<128x32xbf16, #tpu.memory_space<vmem>>, vector<128x32xbf16>
    %cst_56 = arith.constant dense<0.000000e+00> : vector<8x32xf32>
    %173 = tpu.matmul %171, %172, %cst_56 {dimension_numbers = #tpu.dot_dimension_numbers<[1], [0], [0], [1], [0, 0, 1, 1], [], []>} : vector<8x128xbf16>, vector<128x32xbf16>, vector<8x32xf32> -> vector<8x32xf32>
    %c0_57 = arith.constant 0 : index
    %c0_58 = arith.constant 0 : index
    %174 = vector.load %arg12[%c0_57, %c0_58] : memref<1x32xf32, #tpu.memory_space<vmem>>, vector<1x32xf32>
    %175 = vector.broadcast %174 : vector<1x32xf32> to vector<8x32xf32>
    %176 = arith.addf %173, %175 : vector<8x32xf32>
    %177 = arith.addf %127, %176 : vector<8x32xf32>
    %178 = vector.shape_cast %177 : vector<8x32xf32> to vector<1x8x32xf32>
    %c0_59 = arith.constant 0 : index
    %c0_60 = arith.constant 0 : index
    %c0_61 = arith.constant 0 : index
    %179 = vector.load %arg13[%c0_59, %c0_60, %c0_61] : memref<1x8x32xf32, #tpu.memory_space<vmem>>, vector<1x8x32xf32>
    tpu.vector_store %arg13[%c0_59, %c0_60, %c0_61], %178 {strides = array<i32>} : memref<1x8x32xf32, #tpu.memory_space<vmem>>, vector<1x8x32xf32>,
    return
  }
  func.func @transform_0(%arg0: i32) -> (i32, i32, i32) {
    %c0_i32 = arith.constant 0 : i32
    %c0_i32_0 = arith.constant 0 : i32
    %c0_i32_1 = arith.constant 0 : i32
    return %arg0, %c0_i32, %c0_i32_0 : i32, i32, i32
  }
  func.func @transform_1(%arg0: i32) -> (i32, i32) {
    %c0_i32 = arith.constant 0 : i32
    %c0_i32_0 = arith.constant 0 : i32
    %c0_i32_1 = arith.constant 0 : i32
    return %c0_i32, %c0_i32_0 : i32, i32
  }
  func.func @transform_2(%arg0: i32) -> (i32, i32) {
    %c0_i32 = arith.constant 0 : i32
    %c0_i32_0 = arith.constant 0 : i32
    %c0_i32_1 = arith.constant 0 : i32
    return %c0_i32, %c0_i32_0 : i32, i32
  }
  func.func @transform_3(%arg0: i32) -> (i32, i32, i32) {
    %c0_i32 = arith.constant 0 : i32
    %c0_i32_0 = arith.constant 0 : i32
    %c0_i32_1 = arith.constant 0 : i32
    %c0_i32_2 = arith.constant 0 : i32
    return %c0_i32, %c0_i32_0, %c0_i32_1 : i32, i32, i32
  }
  func.func @transform_4(%arg0: i32) -> (i32, i32, i32) {
    %c0_i32 = arith.constant 0 : i32
    %c0_i32_0 = arith.constant 0 : i32
    %c0_i32_1 = arith.constant 0 : i32
    %c0_i32_2 = arith.constant 0 : i32
    return %c0_i32, %c0_i32_0, %c0_i32_1 : i32, i32, i32
  }
  func.func @transform_5(%arg0: i32) -> (i32, i32) {
    %c0_i32 = arith.constant 0 : i32
    %c0_i32_0 = arith.constant 0 : i32
    %c0_i32_1 = arith.constant 0 : i32
    return %c0_i32, %c0_i32_0 : i32, i32
  }
  func.func @transform_6(%arg0: i32) -> (i32, i32) {
    %c0_i32 = arith.constant 0 : i32
    %c0_i32_0 = arith.constant 0 : i32
    %c0_i32_1 = arith.constant 0 : i32
    return %c0_i32, %c0_i32_0 : i32, i32
  }
  func.func @transform_7(%arg0: i32) -> (i32, i32) {
    %c0_i32 = arith.constant 0 : i32
    %c0_i32_0 = arith.constant 0 : i32
    %c0_i32_1 = arith.constant 0 : i32
    return %c0_i32, %c0_i32_0 : i32, i32
  }
  func.func @transform_8(%arg0: i32) -> (i32, i32) {
    %c0_i32 = arith.constant 0 : i32
    %c0_i32_0 = arith.constant 0 : i32
    %c0_i32_1 = arith.constant 0 : i32
    return %c0_i32, %c0_i32_0 : i32, i32
  }
  func.func @transform_9(%arg0: i32) -> (i32, i32) {
    %c0_i32 = arith.constant 0 : i32
    %c0_i32_0 = arith.constant 0 : i32
    %c0_i32_1 = arith.constant 0 : i32
    return %c0_i32, %c0_i32_0 : i32, i32
  }
  func.func @transform_10(%arg0: i32) -> (i32, i32) {
    %c0_i32 = arith.constant 0 : i32
    %c0_i32_0 = arith.constant 0 : i32
    %c0_i32_1 = arith.constant 0 : i32
    return %c0_i32, %c0_i32_0 : i32, i32
  }
  func.func @transform_11(%arg0: i32) -> (i32, i32) {
    %c0_i32 = arith.constant 0 : i32
    %c0_i32_0 = arith.constant 0 : i32
    %c0_i32_1 = arith.constant 0 : i32
    return %c0_i32, %c0_i32_0 : i32, i32
  }
  func.func @transform_12(%arg0: i32) -> (i32, i32, i32) {
    %c0_i32 = arith.constant 0 : i32
    %c0_i32_0 = arith.constant 0 : i32
    %c0_i32_1 = arith.constant 0 : i32
    return %arg0, %c0_i32, %c0_i32_0 : i32, i32, i32
  }
}

module attributes {stable_mosaic.version = 11 : i64} {
  func.func @block_kernel(%arg0: i32, %arg1: memref<1x8x32xf32, #tpu.memory_space<vmem>>, %arg2: memref<1x32xf32, #tpu.memory_space<vmem>>, %arg3: memref<1x32xf32, #tpu.memory_space<vmem>>, %arg4: memref<1x32x96xbf16, #tpu.memory_space<vmem>>, %arg5: memref<1x32x32xbf16, #tpu.memory_space<vmem>>, %arg6: memref<1x32xf32, #tpu.memory_space<vmem>>, %arg7: memref<1x32xf32, #tpu.memory_space<vmem>>, %arg8: memref<1x32xf32, #tpu.memory_space<vmem>>, %arg9: memref<32x128xbf16, #tpu.memory_space<vmem>>, %arg10: memref<1x128xf32, #tpu.memory_space<vmem>>, %arg11: memref<128x32xbf16, #tpu.memory_space<vmem>>, %arg12: memref<1x32xf32, #tpu.memory_space<vmem>>, %arg13: memref<1x8x32xf32, #tpu.memory_space<vmem>>) attributes {dimension_semantics = [#tpu.dimension_semantics<parallel>], iteration_bounds = array<i64: 2>, scalar_prefetch = 0 : i64, scratch_operands = 0 : i64, tpu.core_type = #tpu.core_type<tc>, window_params = [{transform_indices = @transform_0, window_bounds = array<i64: 1, 8, 32>}, {pipeline_mode = #tpu.pipeline_mode<synchronous>, transform_indices = @transform_1, window_bounds = array<i64: 1, 32>}, {pipeline_mode = #tpu.pipeline_mode<synchronous>, transform_indices = @transform_2, window_bounds = array<i64: 1, 32>}, {pipeline_mode = #tpu.pipeline_mode<synchronous>, transform_indices = @transform_3, window_bounds = array<i64: 1, 32, 96>}, {pipeline_mode = #tpu.pipeline_mode<synchronous>, transform_indices = @transform_4, window_bounds = array<i64: 1, 32, 32>}, {pipeline_mode = #tpu.pipeline_mode<synchronous>, transform_indices = @transform_5, window_bounds = array<i64: 1, 32>}, {pipeline_mode = #tpu.pipeline_mode<synchronous>, transform_indices = @transform_6, window_bounds = array<i64: 1, 32>}, {pipeline_mode = #tpu.pipeline_mode<synchronous>, transform_indices = @transform_7, window_bounds = array<i64: 1, 32>}, {pipeline_mode = #tpu.pipeline_mode<synchronous>, transform_indices = @transform_8, window_bounds = array<i64: 32, 128>}, {pipeline_mode = #tpu.pipeline_mode<synchronous>, transform_indices = @transform_9, window_bounds = array<i64: 1, 128>}, {pipeline_mode = #tpu.pipeline_mode<synchronous>, transform_indices = @transform_10, window_bounds = array<i64: 128, 32>}, {pipeline_mode = #tpu.pipeline_mode<synchronous>, transform_indices = @transform_11, window_bounds = array<i64: 1, 32>}, {transform_indices = @transform_12, window_bounds = array<i64: 1, 8, 32>}]} {
    %c0 = arith.constant 0 : index
    %c0_0 = arith.constant 0 : index
    %c0_1 = arith.constant 0 : index
    %0 = vector.load %arg1[%c0, %c0_0, %c0_1] : memref<1x8x32xf32, #tpu.memory_space<vmem>>, vector<1x8x32xf32>
    %1 = vector.shape_cast %0 : vector<1x8x32xf32> to vector<8x32xf32>
    %c0_2 = arith.constant 0 : index
    %c0_3 = arith.constant 0 : index
    %2 = vector.load %arg2[%c0_2, %c0_3] : memref<1x32xf32, #tpu.memory_space<vmem>>, vector<1x32xf32>
    %c0_4 = arith.constant 0 : index
    %c0_5 = arith.constant 0 : index
    %3 = vector.load %arg3[%c0_4, %c0_5] : memref<1x32xf32, #tpu.memory_space<vmem>>, vector<1x32xf32>
    %cst = arith.constant dense<0.000000e+00> : vector<8xf32>
    %4 = vector.multi_reduction <add>, %1, %cst [1] : vector<8x32xf32> to vector<8xf32>
    %5 = vector.shape_cast %4 : vector<8xf32> to vector<8x1xf32>
    %cst_6 = arith.constant 3.200000e+01 : f32
    %6 = vector.broadcast %cst_6 : f32 to vector<8x1xf32>
    %7 = arith.divf %5, %6 : vector<8x1xf32>
    %8 = vector.broadcast %7 : vector<8x1xf32> to vector<8x32xf32>
    %9 = arith.subf %1, %8 : vector<8x32xf32>
    %10 = arith.mulf %9, %9 : vector<8x32xf32>
    %cst_7 = arith.constant dense<0.000000e+00> : vector<8xf32>
    %11 = vector.multi_reduction <add>, %10, %cst_7 [1] : vector<8x32xf32> to vector<8xf32>
    %12 = vector.shape_cast %11 : vector<8xf32> to vector<8x1xf32>
    %cst_8 = arith.constant 3.200000e+01 : f32
    %13 = vector.broadcast %cst_8 : f32 to vector<8x1xf32>
    %14 = arith.divf %12, %13 : vector<8x1xf32>
    %15 = vector.broadcast %7 : vector<8x1xf32> to vector<8x32xf32>
    %16 = arith.subf %1, %15 : vector<8x32xf32>
    %cst_9 = arith.constant 9.99999974E-6 : f32
    %17 = vector.broadcast %cst_9 : f32 to vector<8x1xf32>
    %18 = arith.addf %14, %17 : vector<8x1xf32>
    %19 = math.rsqrt %18 : vector<8x1xf32>
    %20 = vector.broadcast %19 : vector<8x1xf32> to vector<8x32xf32>
    %21 = arith.mulf %16, %20 : vector<8x32xf32>
    %22 = vector.broadcast %2 : vector<1x32xf32> to vector<8x32xf32>
    %23 = arith.mulf %21, %22 : vector<8x32xf32>
    %24 = vector.broadcast %3 : vector<1x32xf32> to vector<8x32xf32>
    %25 = arith.addf %23, %24 : vector<8x32xf32>
    %26 = arith.truncf %25 : vector<8x32xf32> to vector<8x32xbf16>
    %c0_10 = arith.constant 0 : index
    %c0_11 = arith.constant 0 : index
    %c0_12 = arith.constant 0 : index
    %27 = vector.load %arg4[%c0_10, %c0_11, %c0_12] : memref<1x32x96xbf16, #tpu.memory_space<vmem>>, vector<1x32x96xbf16>
    %28 = vector.shape_cast %27 : vector<1x32x96xbf16> to vector<32x96xbf16>
    %cst_13 = arith.constant dense<0.000000e+00> : vector<8x96xf32>
    %29 = tpu.matmul %26, %28, %cst_13 {dimension_numbers = #tpu.dot_dimension_numbers<[1], [0], [0], [1], [0, 0, 1, 1], [], []>} : vector<8x32xbf16>, vector<32x96xbf16>, vector<8x96xf32> -> vector<8x96xf32>
    %30 = vector.extract_strided_slice %29 {offsets = [0, 0], sizes = [8, 8], strides = [1, 1]} : vector<8x96xf32> to vector<8x8xf32>
    %31 = vector.shape_cast %30 : vector<8x8xf32> to vector<1x8x8xf32>
    %32 = arith.truncf %31 : vector<1x8x8xf32> to vector<1x8x8xbf16>
    %33 = vector.extract_strided_slice %29 {offsets = [0, 32], sizes = [8, 8], strides = [1, 1]} : vector<8x96xf32> to vector<8x8xf32>
    %34 = vector.shape_cast %33 : vector<8x8xf32> to vector<1x8x8xf32>
    %35 = arith.truncf %34 : vector<1x8x8xf32> to vector<1x8x8xbf16>
    %36 = vector.extract_strided_slice %29 {offsets = [0, 64], sizes = [8, 8], strides = [1, 1]} : vector<8x96xf32> to vector<8x8xf32>
    %37 = vector.shape_cast %36 : vector<8x8xf32> to vector<1x8x8xf32>
    %38 = arith.truncf %37 : vector<1x8x8xf32> to vector<1x8x8xbf16>
    "tpu.trace_start"() <{level = 10 : i32, message = "bqd,bkd->bqk"}> : () -> ()
    %cst_14 = arith.constant dense<0.000000e+00> : vector<1x8x8xf32>
    %39 = tpu.matmul %32, %35, %cst_14 {dimension_numbers = #tpu.dot_dimension_numbers<[2], [2], [1], [1], [0, 0, 0, 1, 1, 1], [0], [0]>} : vector<1x8x8xbf16>, vector<1x8x8xbf16>, vector<1x8x8xf32> -> vector<1x8x8xf32>
    "tpu.trace_stop"() : () -> ()
    %cst_15 = arith.constant dense<0xFF800000> : vector<1x8xf32>
    %40 = vector.multi_reduction <maximumf>, %39, %cst_15 [2] : vector<1x8x8xf32> to vector<1x8xf32>
    %41 = vector.shape_cast %40 : vector<1x8xf32> to vector<1x8x1xf32>
    %42 = vector.broadcast %41 : vector<1x8x1xf32> to vector<1x8x8xf32>
    %43 = arith.subf %39, %42 : vector<1x8x8xf32>
    %44 = math.exp %43 : vector<1x8x8xf32>
    %cst_16 = arith.constant dense<0.000000e+00> : vector<1x8xf32>
    %45 = vector.multi_reduction <add>, %44, %cst_16 [2] : vector<1x8x8xf32> to vector<1x8xf32>
    %46 = vector.shape_cast %45 : vector<1x8xf32> to vector<1x8x1xf32>
    %47 = tpu.reciprocal %46 {approx = true} : vector<1x8x1xf32> -> vector<1x8x1xf32>
    %48 = vector.broadcast %47 : vector<1x8x1xf32> to vector<1x8x8xf32>
    %49 = arith.mulf %44, %48 : vector<1x8x8xf32>
    %50 = arith.truncf %49 : vector<1x8x8xf32> to vector<1x8x8xbf16>
    "tpu.trace_start"() <{level = 10 : i32, message = "bqk,bkd->bqd"}> : () -> ()
    %cst_17 = arith.constant dense<0.000000e+00> : vector<1x8x8xf32>
    %51 = tpu.matmul %50, %38, %cst_17 {dimension_numbers = #tpu.dot_dimension_numbers<[2], [1], [1], [2], [0, 0, 0, 1, 1, 2], [0], [0]>} : vector<1x8x8xbf16>, vector<1x8x8xbf16>, vector<1x8x8xf32> -> vector<1x8x8xf32>
    "tpu.trace_stop"() : () -> ()
    %52 = vector.extract_strided_slice %29 {offsets = [0, 8], sizes = [8, 8], strides = [1, 1]} : vector<8x96xf32> to vector<8x8xf32>
    %53 = vector.shape_cast %52 : vector<8x8xf32> to vector<1x8x8xf32>
    %54 = arith.truncf %53 : vector<1x8x8xf32> to vector<1x8x8xbf16>
    %55 = vector.extract_strided_slice %29 {offsets = [0, 40], sizes = [8, 8], strides = [1, 1]} : vector<8x96xf32> to vector<8x8xf32>
    %56 = vector.shape_cast %55 : vector<8x8xf32> to vector<1x8x8xf32>
    %57 = arith.truncf %56 : vector<1x8x8xf32> to vector<1x8x8xbf16>
    %58 = vector.extract_strided_slice %29 {offsets = [0, 72], sizes = [8, 8], strides = [1, 1]} : vector<8x96xf32> to vector<8x8xf32>
    %59 = vector.shape_cast %58 : vector<8x8xf32> to vector<1x8x8xf32>
    %60 = arith.truncf %59 : vector<1x8x8xf32> to vector<1x8x8xbf16>
    "tpu.trace_start"() <{level = 10 : i32, message = "bqd,bkd->bqk"}> : () -> ()
    %cst_18 = arith.constant dense<0.000000e+00> : vector<1x8x8xf32>
    %61 = tpu.matmul %54, %57, %cst_18 {dimension_numbers = #tpu.dot_dimension_numbers<[2], [2], [1], [1], [0, 0, 0, 1, 1, 1], [0], [0]>} : vector<1x8x8xbf16>, vector<1x8x8xbf16>, vector<1x8x8xf32> -> vector<1x8x8xf32>
    "tpu.trace_stop"() : () -> ()
    %cst_19 = arith.constant dense<0xFF800000> : vector<1x8xf32>
    %62 = vector.multi_reduction <maximumf>, %61, %cst_19 [2] : vector<1x8x8xf32> to vector<1x8xf32>
    %63 = vector.shape_cast %62 : vector<1x8xf32> to vector<1x8x1xf32>
    %64 = vector.broadcast %63 : vector<1x8x1xf32> to vector<1x8x8xf32>
    %65 = arith.subf %61, %64 : vector<1x8x8xf32>
    %66 = math.exp %65 : vector<1x8x8xf32>
    %cst_20 = arith.constant dense<0.000000e+00> : vector<1x8xf32>
    %67 = vector.multi_reduction <add>, %66, %cst_20 [2] : vector<1x8x8xf32> to vector<1x8xf32>
    %68 = vector.shape_cast %67 : vector<1x8xf32> to vector<1x8x1xf32>
    %69 = tpu.reciprocal %68 {approx = true} : vector<1x8x1xf32> -> vector<1x8x1xf32>
    %70 = vector.broadcast %69 : vector<1x8x1xf32> to vector<1x8x8xf32>
    %71 = arith.mulf %66, %70 : vector<1x8x8xf32>
    %72 = arith.truncf %71 : vector<1x8x8xf32> to vector<1x8x8xbf16>
    "tpu.trace_start"() <{level = 10 : i32, message = "bqk,bkd->bqd"}> : () -> ()
    %cst_21 = arith.constant dense<0.000000e+00> : vector<1x8x8xf32>
    %73 = tpu.matmul %72, %60, %cst_21 {dimension_numbers = #tpu.dot_dimension_numbers<[2], [1], [1], [2], [0, 0, 0, 1, 1, 2], [0], [0]>} : vector<1x8x8xbf16>, vector<1x8x8xbf16>, vector<1x8x8xf32> -> vector<1x8x8xf32>
    "tpu.trace_stop"() : () -> ()
    %74 = vector.extract_strided_slice %29 {offsets = [0, 16], sizes = [8, 8], strides = [1, 1]} : vector<8x96xf32> to vector<8x8xf32>
    %75 = vector.shape_cast %74 : vector<8x8xf32> to vector<1x8x8xf32>
    %76 = arith.truncf %75 : vector<1x8x8xf32> to vector<1x8x8xbf16>
    %77 = vector.extract_strided_slice %29 {offsets = [0, 48], sizes = [8, 8], strides = [1, 1]} : vector<8x96xf32> to vector<8x8xf32>
    %78 = vector.shape_cast %77 : vector<8x8xf32> to vector<1x8x8xf32>
    %79 = arith.truncf %78 : vector<1x8x8xf32> to vector<1x8x8xbf16>
    %80 = vector.extract_strided_slice %29 {offsets = [0, 80], sizes = [8, 8], strides = [1, 1]} : vector<8x96xf32> to vector<8x8xf32>
    %81 = vector.shape_cast %80 : vector<8x8xf32> to vector<1x8x8xf32>
    %82 = arith.truncf %81 : vector<1x8x8xf32> to vector<1x8x8xbf16>
    "tpu.trace_start"() <{level = 10 : i32, message = "bqd,bkd->bqk"}> : () -> ()
    %cst_22 = arith.constant dense<0.000000e+00> : vector<1x8x8xf32>
    %83 = tpu.matmul %76, %79, %cst_22 {dimension_numbers = #tpu.dot_dimension_numbers<[2], [2], [1], [1], [0, 0, 0, 1, 1, 1], [0], [0]>} : vector<1x8x8xbf16>, vector<1x8x8xbf16>, vector<1x8x8xf32> -> vector<1x8x8xf32>
    "tpu.trace_stop"() : () -> ()
    %cst_23 = arith.constant dense<0xFF800000> : vector<1x8xf32>
    %84 = vector.multi_reduction <maximumf>, %83, %cst_23 [2] : vector<1x8x8xf32> to vector<1x8xf32>
    %85 = vector.shape_cast %84 : vector<1x8xf32> to vector<1x8x1xf32>
    %86 = vector.broadcast %85 : vector<1x8x1xf32> to vector<1x8x8xf32>
    %87 = arith.subf %83, %86 : vector<1x8x8xf32>
    %88 = math.exp %87 : vector<1x8x8xf32>
    %cst_24 = arith.constant dense<0.000000e+00> : vector<1x8xf32>
    %89 = vector.multi_reduction <add>, %88, %cst_24 [2] : vector<1x8x8xf32> to vector<1x8xf32>
    %90 = vector.shape_cast %89 : vector<1x8xf32> to vector<1x8x1xf32>
    %91 = tpu.reciprocal %90 {approx = true} : vector<1x8x1xf32> -> vector<1x8x1xf32>
    %92 = vector.broadcast %91 : vector<1x8x1xf32> to vector<1x8x8xf32>
    %93 = arith.mulf %88, %92 : vector<1x8x8xf32>
    %94 = arith.truncf %93 : vector<1x8x8xf32> to vector<1x8x8xbf16>
    "tpu.trace_start"() <{level = 10 : i32, message = "bqk,bkd->bqd"}> : () -> ()
    %cst_25 = arith.constant dense<0.000000e+00> : vector<1x8x8xf32>
    %95 = tpu.matmul %94, %82, %cst_25 {dimension_numbers = #tpu.dot_dimension_numbers<[2], [1], [1], [2], [0, 0, 0, 1, 1, 2], [0], [0]>} : vector<1x8x8xbf16>, vector<1x8x8xbf16>, vector<1x8x8xf32> -> vector<1x8x8xf32>
    "tpu.trace_stop"() : () -> ()
    %96 = vector.extract_strided_slice %29 {offsets = [0, 24], sizes = [8, 8], strides = [1, 1]} : vector<8x96xf32> to vector<8x8xf32>
    %97 = vector.shape_cast %96 : vector<8x8xf32> to vector<1x8x8xf32>
    %98 = arith.truncf %97 : vector<1x8x8xf32> to vector<1x8x8xbf16>
    %99 = vector.extract_strided_slice %29 {offsets = [0, 56], sizes = [8, 8], strides = [1, 1]} : vector<8x96xf32> to vector<8x8xf32>
    %100 = vector.shape_cast %99 : vector<8x8xf32> to vector<1x8x8xf32>
    %101 = arith.truncf %100 : vector<1x8x8xf32> to vector<1x8x8xbf16>
    %102 = vector.extract_strided_slice %29 {offsets = [0, 88], sizes = [8, 8], strides = [1, 1]} : vector<8x96xf32> to vector<8x8xf32>
    %103 = vector.shape_cast %102 : vector<8x8xf32> to vector<1x8x8xf32>
    %104 = arith.truncf %103 : vector<1x8x8xf32> to vector<1x8x8xbf16>
    "tpu.trace_start"() <{level = 10 : i32, message = "bqd,bkd->bqk"}> : () -> ()
    %cst_26 = arith.constant dense<0.000000e+00> : vector<1x8x8xf32>
    %105 = tpu.matmul %98, %101, %cst_26 {dimension_numbers = #tpu.dot_dimension_numbers<[2], [2], [1], [1], [0, 0, 0, 1, 1, 1], [0], [0]>} : vector<1x8x8xbf16>, vector<1x8x8xbf16>, vector<1x8x8xf32> -> vector<1x8x8xf32>
    "tpu.trace_stop"() : () -> ()
    %cst_27 = arith.constant dense<0xFF800000> : vector<1x8xf32>
    %106 = vector.multi_reduction <maximumf>, %105, %cst_27 [2] : vector<1x8x8xf32> to vector<1x8xf32>
    %107 = vector.shape_cast %106 : vector<1x8xf32> to vector<1x8x1xf32>
    %108 = vector.broadcast %107 : vector<1x8x1xf32> to vector<1x8x8xf32>
    %109 = arith.subf %105, %108 : vector<1x8x8xf32>
    %110 = math.exp %109 : vector<1x8x8xf32>
    %cst_28 = arith.constant dense<0.000000e+00> : vector<1x8xf32>
    %111 = vector.multi_reduction <add>, %110, %cst_28 [2] : vector<1x8x8xf32> to vector<1x8xf32>
    %112 = vector.shape_cast %111 : vector<1x8xf32> to vector<1x8x1xf32>
    %113 = tpu.reciprocal %112 {approx = true} : vector<1x8x1xf32> -> vector<1x8x1xf32>
    %114 = vector.broadcast %113 : vector<1x8x1xf32> to vector<1x8x8xf32>
    %115 = arith.mulf %110, %114 : vector<1x8x8xf32>
    %116 = arith.truncf %115 : vector<1x8x8xf32> to vector<1x8x8xbf16>
    "tpu.trace_start"() <{level = 10 : i32, message = "bqk,bkd->bqd"}> : () -> ()
    %cst_29 = arith.constant dense<0.000000e+00> : vector<1x8x8xf32>
    %117 = tpu.matmul %116, %104, %cst_29 {dimension_numbers = #tpu.dot_dimension_numbers<[2], [1], [1], [2], [0, 0, 0, 1, 1, 2], [0], [0]>} : vector<1x8x8xbf16>, vector<1x8x8xbf16>, vector<1x8x8xf32> -> vector<1x8x8xf32>
    "tpu.trace_stop"() : () -> ()
    %118 = tpu.concatenate %51, %73, %95, %117 in 2 : vector<1x8x8xf32>, vector<1x8x8xf32>, vector<1x8x8xf32>, vector<1x8x8xf32> -> vector<1x8x32xf32>
    %119 = vector.shape_cast %118 : vector<1x8x32xf32> to vector<8x32xf32>
    %120 = arith.truncf %119 : vector<8x32xf32> to vector<8x32xbf16>
    %c0_30 = arith.constant 0 : index
    %c0_31 = arith.constant 0 : index
    %c0_32 = arith.constant 0 : index
    %121 = vector.load %arg5[%c0_30, %c0_31, %c0_32] : memref<1x32x32xbf16, #tpu.memory_space<vmem>>, vector<1x32x32xbf16>
    %122 = vector.shape_cast %121 : vector<1x32x32xbf16> to vector<32x32xbf16>
    %cst_33 = arith.constant dense<0.000000e+00> : vector<8x32xf32>
    %123 = tpu.matmul %120, %122, %cst_33 {dimension_numbers = #tpu.dot_dimension_numbers<[1], [0], [0], [1], [0, 0, 1, 1], [], []>} : vector<8x32xbf16>, vector<32x32xbf16>, vector<8x32xf32> -> vector<8x32xf32>
    %124 = arith.addf %1, %123 : vector<8x32xf32>
    %c0_34 = arith.constant 0 : index
    %c0_35 = arith.constant 0 : index
    %125 = vector.load %arg6[%c0_34, %c0_35] : memref<1x32xf32, #tpu.memory_space<vmem>>, vector<1x32xf32>
    %126 = vector.broadcast %125 : vector<1x32xf32> to vector<8x32xf32>
    %127 = arith.addf %124, %126 : vector<8x32xf32>
    %c0_36 = arith.constant 0 : index
    %c0_37 = arith.constant 0 : index
    %128 = vector.load %arg7[%c0_36, %c0_37] : memref<1x32xf32, #tpu.memory_space<vmem>>, vector<1x32xf32>
    %c0_38 = arith.constant 0 : index
    %c0_39 = arith.constant 0 : index
    %129 = vector.load %arg8[%c0_38, %c0_39] : memref<1x32xf32, #tpu.memory_space<vmem>>, vector<1x32xf32>
    %cst_40 = arith.constant dense<0.000000e+00> : vector<8xf32>
    %130 = vector.multi_reduction <add>, %127, %cst_40 [1] : vector<8x32xf32> to vector<8xf32>
    %131 = vector.shape_cast %130 : vector<8xf32> to vector<8x1xf32>
    %cst_41 = arith.constant 3.200000e+01 : f32
    %132 = vector.broadcast %cst_41 : f32 to vector<8x1xf32>
    %133 = arith.divf %131, %132 : vector<8x1xf32>
    %134 = vector.broadcast %133 : vector<8x1xf32> to vector<8x32xf32>
    %135 = arith.subf %127, %134 : vector<8x32xf32>
    %136 = arith.mulf %135, %135 : vector<8x32xf32>
    %cst_42 = arith.constant dense<0.000000e+00> : vector<8xf32>
    %137 = vector.multi_reduction <add>, %136, %cst_42 [1] : vector<8x32xf32> to vector<8xf32>
    %138 = vector.shape_cast %137 : vector<8xf32> to vector<8x1xf32>
    %cst_43 = arith.constant 3.200000e+01 : f32
    %139 = vector.broadcast %cst_43 : f32 to vector<8x1xf32>
    %140 = arith.divf %138, %139 : vector<8x1xf32>
    %141 = vector.broadcast %133 : vector<8x1xf32> to vector<8x32xf32>
    %142 = arith.subf %127, %141 : vector<8x32xf32>
    %cst_44 = arith.constant 9.99999974E-6 : f32
    %143 = vector.broadcast %cst_44 : f32 to vector<8x1xf32>
    %144 = arith.addf %140, %143 : vector<8x1xf32>
    %145 = math.rsqrt %144 : vector<8x1xf32>
    %146 = vector.broadcast %145 : vector<8x1xf32> to vector<8x32xf32>
    %147 = arith.mulf %142, %146 : vector<8x32xf32>
    %148 = vector.broadcast %128 : vector<1x32xf32> to vector<8x32xf32>
    %149 = arith.mulf %147, %148 : vector<8x32xf32>
    %150 = vector.broadcast %129 : vector<1x32xf32> to vector<8x32xf32>
    %151 = arith.addf %149, %150 : vector<8x32xf32>
    %152 = arith.truncf %151 : vector<8x32xf32> to vector<8x32xbf16>
    %c0_45 = arith.constant 0 : index
    %c0_46 = arith.constant 0 : index
    %153 = vector.load %arg9[%c0_45, %c0_46] : memref<32x128xbf16, #tpu.memory_space<vmem>>, vector<32x128xbf16>
    %cst_47 = arith.constant dense<0.000000e+00> : vector<8x128xf32>
    %154 = tpu.matmul %152, %153, %cst_47 {dimension_numbers = #tpu.dot_dimension_numbers<[1], [0], [0], [1], [0, 0, 1, 1], [], []>} : vector<8x32xbf16>, vector<32x128xbf16>, vector<8x128xf32> -> vector<8x128xf32>
    %c0_48 = arith.constant 0 : index
    %c0_49 = arith.constant 0 : index
    %155 = vector.load %arg10[%c0_48, %c0_49] : memref<1x128xf32, #tpu.memory_space<vmem>>, vector<1x128xf32>
    %156 = vector.broadcast %155 : vector<1x128xf32> to vector<8x128xf32>
    %157 = arith.addf %154, %156 : vector<8x128xf32>
    %cst_50 = arith.constant 5.000000e-01 : f32
    %158 = vector.broadcast %cst_50 : f32 to vector<8x128xf32>
    %159 = arith.mulf %158, %157 : vector<8x128xf32>
    %160 = arith.mulf %157, %157 : vector<8x128xf32>
    %161 = arith.mulf %160, %157 : vector<8x128xf32>
    %cst_51 = arith.constant 4.471500e-02 : f32
    %162 = vector.broadcast %cst_51 : f32 to vector<8x128xf32>
    %163 = arith.mulf %162, %161 : vector<8x128xf32>
    %164 = arith.addf %157, %163 : vector<8x128xf32>
    %cst_52 = arith.constant 0.797884583 : f32
    %165 = vector.broadcast %cst_52 : f32 to vector<8x128xf32>
    %166 = arith.mulf %165, %164 : vector<8x128xf32>
    %167 = math.tanh %166 : vector<8x128xf32>
    %cst_53 = arith.constant 1.000000e+00 : f32
    %168 = vector.broadcast %cst_53 : f32 to vector<8x128xf32>
    %169 = arith.addf %168, %167 : vector<8x128xf32>
    %170 = arith.mulf %159, %169 : vector<8x128xf32>
    %171 = arith.truncf %170 : vector<8x128xf32> to vector<8x128xbf16>
    %c0_54 = arith.constant 0 : index
    %c0_55 = arith.constant 0 : index
    %172 = vector.load %arg11[%c0_54, %c0_55] : memref<128x32xbf16, #tpu.memory_space<vmem>>, vector<128x32xbf16>
    %cst_56 = arith.constant dense<0.000000e+00> : vector<8x32xf32>
    %173 = tpu.matmul %171, %172, %cst_56 {dimension_numbers = #tpu.dot_dimension_numbers<[1], [0], [0], [1], [0, 0, 1, 1], [], []>} : vector<8x128xbf16>, vector<128x32xbf16>, vector<8x32xf32> -> vector<8x32xf32>
    %c0_57 = arith.constant 0 : index
    %c0_58 = arith.constant 0 : index
    %174 = vector.load %arg12[%c0_57, %c0_58] : memref<1x32xf32, #tpu.memory_space<vmem>>, vector<1x32xf32>
    %175 = vector.broadcast %174 : vector<1x32xf32> to vector<8x32xf32>
    %176 = arith.addf %173, %175 : vector<8x32xf32>
    %177 = arith.addf %127, %176 : vector<8x32xf32>
    %178 = vector.shape_cast %177 : vector<8x32xf32> to vector<1x8x32xf32>
    %c0_59 = arith.constant 0 : index
    %c0_60 = arith.constant 0 : index
    %c0_61 = arith.constant 0 : index
    %179 = vector.load %arg13[%c0_59, %c0_60, %c0_61] : memref<1x8x32xf32, #tpu.memory_space<vmem>>, vector<1x8x32xf32>
    tpu.vector_store %arg13[%c0_59, %c0_60, %c0_61], %178 {strides = array<i32>} : memref<1x8x32xf32, #tpu.memory_space<vmem>>, vector<1x8x32xf32>,
    return
  }
  func.func @transform_0(%arg0: i32) -> (i32, i32, i32) {
    %c0_i32 = arith.constant 0 : i32
    %c0_i32_0 = arith.constant 0 : i32
    %c0_i32_1 = arith.constant 0 : i32
    return %arg0, %c0_i32, %c0_i32_0 : i32, i32, i32
  }
  func.func @transform_1(%arg0: i32) -> (i32, i32) {
    %c0_i32 = arith.constant 0 : i32
    %c0_i32_0 = arith.constant 0 : i32
    %c0_i32_1 = arith.constant 0 : i32
    return %c0_i32, %c0_i32_0 : i32, i32
  }
  func.func @transform_2(%arg0: i32) -> (i32, i32) {
    %c0_i32 = arith.constant 0 : i32
    %c0_i32_0 = arith.constant 0 : i32
    %c0_i32_1 = arith.constant 0 : i32
    return %c0_i32, %c0_i32_0 : i32, i32
  }
  func.func @transform_3(%arg0: i32) -> (i32, i32, i32) {
    %c0_i32 = arith.constant 0 : i32
    %c0_i32_0 = arith.constant 0 : i32
    %c0_i32_1 = arith.constant 0 : i32
    %c0_i32_2 = arith.constant 0 : i32
    return %c0_i32, %c0_i32_0, %c0_i32_1 : i32, i32, i32
  }
  func.func @transform_4(%arg0: i32) -> (i32, i32, i32) {
    %c0_i32 = arith.constant 0 : i32
    %c0_i32_0 = arith.constant 0 : i32
    %c0_i32_1 = arith.constant 0 : i32
    %c0_i32_2 = arith.constant 0 : i32
    return %c0_i32, %c0_i32_0, %c0_i32_1 : i32, i32, i32
  }
  func.func @transform_5(%arg0: i32) -> (i32, i32) {
    %c0_i32 = arith.constant 0 : i32
    %c0_i32_0 = arith.constant 0 : i32
    %c0_i32_1 = arith.constant 0 : i32
    return %c0_i32, %c0_i32_0 : i32, i32
  }
  func.func @transform_6(%arg0: i32) -> (i32, i32) {
    %c0_i32 = arith.constant 0 : i32
    %c0_i32_0 = arith.constant 0 : i32
    %c0_i32_1 = arith.constant 0 : i32
    return %c0_i32, %c0_i32_0 : i32, i32
  }
  func.func @transform_7(%arg0: i32) -> (i32, i32) {
    %c0_i32 = arith.constant 0 : i32
    %c0_i32_0 = arith.constant 0 : i32
    %c0_i32_1 = arith.constant 0 : i32
    return %c0_i32, %c0_i32_0 : i32, i32
  }
  func.func @transform_8(%arg0: i32) -> (i32, i32) {
    %c0_i32 = arith.constant 0 : i32
    %c0_i32_0 = arith.constant 0 : i32
    %c0_i32_1 = arith.constant 0 : i32
    return %c0_i32, %c0_i32_0 : i32, i32
  }
  func.func @transform_9(%arg0: i32) -> (i32, i32) {
    %c0_i32 = arith.constant 0 : i32
    %c0_i32_0 = arith.constant 0 : i32
    %c0_i32_1 = arith.constant 0 : i32
    return %c0_i32, %c0_i32_0 : i32, i32
  }
  func.func @transform_10(%arg0: i32) -> (i32, i32) {
    %c0_i32 = arith.constant 0 : i32
    %c0_i32_0 = arith.constant 0 : i32
    %c0_i32_1 = arith.constant 0 : i32
    return %c0_i32, %c0_i32_0 : i32, i32
  }
  func.func @transform_11(%arg0: i32) -> (i32, i32) {
    %c0_i32 = arith.constant 0 : i32
    %c0_i32_0 = arith.constant 0 : i32
    %c0_i32_1 = arith.constant 0 : i32
    return %c0_i32, %c0_i32_0 : i32, i32
  }
  func.func @transform_12(%arg0: i32) -> (i32, i32, i32) {
    %c0_i32 = arith.constant 0 : i32
    %c0_i32_0 = arith.constant 0 : i32
    %c0_i32_1 = arith.constant 0 : i32
    return %arg0, %c0_i32, %c0_i32_0 : i32, i32, i32
  }
}

</mosaic_0001>

<bundles_post_ra>
// kernel: tpu_custom_call.1
= control target key start
LH: loop header
LB: loop body
LE: loop exit
PB: predicated region body
PF: predicated region fallthrough
CT: control target
= control target key end

     0   :  { %s1990_s0 = inlined_call_operand.vmem [shape: f32[2,8,32], index: 0, kind: input, shape index: {}]   ;;  %s1991_s1 = inlined_call_operand.vmem [shape: f32[1,32], index: 1, kind: input, shape index: {}]   ;;  %s1992_s2 = inlined_call_operand.vmem [shape: f32[1,32], index: 2, kind: input, shape index: {}]   ;;  %s1993_s3 = inlined_call_operand.vmem [shape: bf16[1,32,96], index: 3, kind: input, shape index: {}]   ;;  %s1994_s4 = inlined_call_operand.vmem [shape: bf16[1,32,32], index: 4, kind: input, shape index: {}]   ;;  %s1995_s5 = inlined_call_operand.vmem [shape: f32[1,32], index: 5, kind: input, shape index: {}]   ;;  %s1996_s6 = inlined_call_operand.vmem [shape: f32[1,32], index: 6, kind: input, shape index: {}]   ;;  %s1997_s7 = inlined_call_operand.vmem [shape: f32[1,32], index: 7, kind: input, shape index: {}]   ;;  %s1998_s8 = inlined_call_operand.vmem [shape: bf16[32,128], index: 8, kind: input, shape index: {}]   ;;  %s1999_s9 = inlined_call_operand.vmem [shape: f32[1,128], index: 9, kind: input, shape index: {}]   ;;  %s2000_s10 = inlined_call_operand.vmem [shape: bf16[128,32], index: 10, kind: input, shape index: {}]   ;;  %s2001_s11 = inlined_call_operand.vmem [shape: f32[1,32], index: 11, kind: input, shape index: {}]   ;;  %s2002_s12 = inlined_call_operand.hbm [shape: f32[2,8,32], index: 12, kind: output, shape index: {}]  }
   0x1   :  { %2003 = sst [smem:[#allocation5_spill]] %s1990_s0 }
   0x2   :  { %2004 = sst [smem:[#allocation6_spill]] %s1991_s1 }
   0x3   :  { %17 = vsyncpa [#allocation3], 0 }
   0x4   :  { %19 = vsyncpa [#allocation3 + $0x1], 0  ;;  %s1725_s21 = smov 0   ;;  %s1727_s22 = smov 0  }
   0x5   :  { %s1729_s23 = smov 0   ;;  %s1731_s24 = smov 0  }
   0x6 LB: > { %s1746_s25 = sadd.s32 4294967295, %s1641_s24   ;;  %s1322_s26 = sadd.s32 4294967294, %s1641_s24   ;;  %s1641_s24 = sphi %s1731_s24, %s2012_s24   ;;  %s1637_s23 = sphi %s1729_s23, %s2011_s23   ;;  %s1633_s22 = sphi %s1727_s22, %s2010_s22   ;;  %s1629_s21 = sphi %s1725_s21, %s2009_s21  }
   0x7   : > { %s1750_s27 = sadd.s32 1, %s1641_s24   ;;  %s289_s28 = sadd.s32 1, %s1637_s23 }
   0x8   : > { %s286_s29 = ssub.s32 %s1641_s24, %s1750_s27  ;;  %p299_p0 = scmp.ne.s32.totalorder %s1637_s23, %s1633_s22 }
   0x9   : > { %p287_p1 = scmp.eq.s32.totalorder %s286_s29, 0  ;;  %p300_p2 = scmp.eq.s32.totalorder %s1746_s25, 1 }
   0xa   : > { %p305_p3 = scmp.ne.s32.totalorder %s1633_s22, %s1629_s21  ;;  %p306_p4 = scmp.eq.s32.totalorder %s1322_s26, 1 }
   0xb   : > { %s1761_s30 = scalar_select %p287_p1, %s1637_s23, %s289_s28  }
   0xc   : > { %p1763_p5 = por %p300_p2, %p299_p0  ;;  %p1767_p6 = por %p306_p4, %p305_p3 }
   0xd   : > { %p1325_p7 = scmp.ge.s32.totalorder %s1641_s24, 1  ;;  %p364_p8 = scmp.lt.s32.totalorder %s1641_s24, 3 }
   0xf   : > { %p365_p9 = pnand %p1325_p7, %p364_p8 }
  0x10   : > { %p405_p10 = scmp.lt.s32.totalorder (!%p365_p9), %s1746_s25, 1  ;;  %s2007_s0 = sld [smem:[#allocation5_spill]] (!%p365_p9) }
  0x11   : > { %368 = sbr.rel (%p365_p9) target bundleno = 2477 (0x9ad), region = 68  ;;  %s2008_s1 = sld [smem:[#allocation6_spill]] (!%p365_p9) }
  0x12   : > { %s1646_s20 = smov (!%p365_p9), 96   ;;  %s1647_s26 = smov (!%p365_p9), 88  }
  0x13   : > { %s1648_s28 = smov (!%p365_p9), 80   ;;  %s1649_s29 = smov (!%p365_p9), 112  }
  0x14   : > { %s1652_s17 = smov (!%p365_p9), 64   ;;  %s1653_s18 = smov (!%p365_p9), 56  }
  0x16   : > { %s406_s15 = scalar_select %p405_p10, %s1746_s25, 1  ;;  %vm413_vm0 = vcmask 261120   ;;  %v1545_v7 = vld [vmem:[%s1993_s3 + $0x8] sm:$0xff]   ;;  %v1643_v8 = vmov 0.0   ;;  %vm1644_vm1 = vmmov 0   ;;  %v1546_v9 = vld [vmem:[%s1993_s3] sm:$0xff]  }
  0x17   : > { %1398 = vmatprep.subr.bf16.mxu0 %v1643_v8  ;;  %1402 = vmatprep.mubr.msk.bf16.mxu0 %vm1644_vm1, %v1643_v8  ;;  %v1328_v14 = vld [vmem:[%s2008_s1] ss:$0 sm:$0xff]  ;;  %vm506_vm2 = vcmask 64512   ;;  %vm570_vm3 = vcmask 1043456   ;;  %vm957_vm4 = vcmask 130048   ;;  %vm959_vm5 = vcmask 195584  }
  0x18   : > { %s1327_s16 = sshll.u32 %s406_s15, 3  ;;  %1399 = vmatpush3.bf16.msra.mxu0 %v1545_v7  ;;  %1418 = vmatprep.subr.bf16.mxu1 %v1643_v8  ;;  %v1329_v16 = vld [vmem:[%s1992_s2] ss:$0 sm:$0xff]  ;;  %s1650_s15 = smov 72  }
  0x19   : > { %s408_s19 = scalar_lea.vmem %s2007_s0, %s1327_s16  ;;  %1400 = vmatprep.subr.bf16.mxu0 %v1643_v8  ;;  %1420 = vmatprep.mubr.msk.bf16.mxu1 %vm1644_vm1, %v1643_v8  ;;  %s1651_s16 = smov 104  }
  0x1a   : > { %v1778_v0 = vld [vmem:[%s408_s19] sm:$0xff]  ;;  %s1645_s19 = smov 120  }
  0x1b   : > { %v414_v1 = vsel %vm413_vm0, %v1778_v0, 0.0 }
  0x1c   : > { %415 = vadd.xlane.f32.xlu0 %v414_v1  ;;  %1401 = vmatpush3.bf16.msra.mxu0 %v1546_v9 }
  0x1d   : > { %1406 = vmatprep.subr.bf16.mxu0 %v1643_v8 }
  0xa5   : > { %v416_v2 = vpop.xlane.xlu0 %415 }
  0xa6   : > { %v418_v3 = vmul.f32 0.03125, %v416_v2 }
  0xa8   : > { %v419_v4 = vsub.f32 %v1778_v0, %v418_v3 }
  0xaa   : > { %v420_v5 = vmul.f32 %v419_v4, %v419_v4 }
  0xac   : > { %v421_v6 = vsel %vm413_vm0, %v420_v5, 0.0 }
  0xad   : > { %422 = vadd.xlane.f32.xlu0 %v421_v6 }
 0x136   : > { %v423_v10 = vpop.xlane.xlu0 %422 }
 0x137   : > { %v424_v11 = vmul.f32 0.03125, %v423_v10 }
 0x139   : > { %v425_v12 = vadd.f32 1e-05, %v424_v11 }
 0x13b   : > { %1559 = vrsqrt.f32 %v425_v12 }
 0x148   : > { %v1560_v13 = vpop.eup %1559 }
 0x149   : > { %v427_v15 = vmul.f32 %v1560_v13, %v419_v4 }
 0x14b   : > { %v434_v17 = vmul.f32 %v1328_v14, %v427_v15 }
 0x14d   : > { %v441_v18 = vadd.f32 %v1329_v16, %v434_v17 }
 0x14f   : > { %v442_v19 = vpack.c.bf16 %v441_v18, %v441_v18 }
 0x151   : > { %1403 = vmatmul.mubr.msk.bf16.vlgmr.msra.gmra.mxu0 %vm413_vm0, %v442_v19 }
 0x152   : > { %1408 = vmatprep.mubr.msk.bf16.mxu0 %vm1644_vm1, %v1643_v8 }
 0x211   : > { %v496_v20 = vpop.f32.mrf.mxu0 }
 0x212   : > { %v1807_v21 = vpack.c.bf16 %v496_v20, %v496_v20 }
 0x213   : > { %v1404_v22 = vpop.f32.mrf.mxu0 }
 0x214   : > { %614 = vrot.lane.b32.xlu0 %v1807_v21, %s1645_s19  ;;  %504 = vrot.lane.b32.xlu1 %v1807_v21, %s1646_s20  ;;  %s1654_s19 = smov 48   ;;  %s1655_s20 = smov 40  }
 0x215   : > { %v499_v23 = vpop.f32.mrf.mxu0 }
 0x217   : > { %v1405_v24 = vpop.f32.mrf.mxu0 }
 0x218   : > { %616 = vrot.lane.b32.xlu1 %v1807_v21, %s1647_s26  ;;  %s1656_s26 = smov 8  }
 0x21c   : > { %726 = vrot.lane.b32.xlu1 %v1807_v21, %s1648_s28  ;;  %s1659_s28 = smov [#allocation2]  }
 0x220   : > { %724 = vrot.lane.b32.xlu1 %v1807_v21, %s1649_s29  ;;  %s1585_s29 = sshll.u32 %s1659_s28, 4  ;;  %s1586_s29 = int_to_ptr.vmem [resolvable:$false] %s1585_s29 }
 0x224   : > { %836 = vrot.lane.b32.xlu1 %v1807_v21, %s1650_s15  ;;  %s1361_s15 = sshll.u32 %s1746_s25, 7 }
 0x225   : > { %s1948_s0 = scalar_lea.hbm %s2002_s12, %s1361_s15  ;;  %s1587_s15 = scalar_lea.vmem %s1586_s29, 256 }
 0x228   : > { %834 = vrot.lane.b32.xlu1 %v1807_v21, %s1651_s16 }
 0x286   : > { %v505_v25 = vpop.permute.xlu1 %504  ;;  %v615_v30 = vpop.permute.xlu0 %614 }
 0x287   : > { %v511_v26 = vsel %vm506_vm2, %v505_v25, 0 }
 0x288   : > { %1407 = vmatpush3.bf16.xpose.msra.mxu0 %v511_v26 }
 0x289   : > { %1412 = vmatprep.subr.bf16.mxu0 %v1643_v8 }
 0x28a   : > { %v617_v27 = vpop.permute.xlu1 %616 }
 0x28b   : > { %v622_v28 = vsel %vm506_vm2, %v617_v27, 0 }
 0x28c   : > { %1419 = vmatpush3.bf16.xpose.msra.mxu1 %v622_v28 }
 0x28d   : > { %1430 = vmatprep.subr.bf16.mxu1 %v1643_v8 }
 0x28e   : > { %v727_v29 = vpop.permute.xlu1 %726 }
 0x28f   : > { %1409 = vmatmul.mubr.msk.bf16.vlgmr.msra.gmra.mxu0 %vm506_vm2, %v1807_v21  ;;  %v732_v32 = vsel %vm506_vm2, %v727_v29, 0 }
 0x290   : > { %1414 = vmatprep.mubr.msk.bf16.mxu0 %vm1644_vm1, %v1643_v8 }
 0x292   : > { %v725_v31 = vpop.permute.xlu1 %724 }
 0x293   : > { %1421 = vmatmul.mubr.msk.bf16.vlgmr.msra.gmra.mxu1 %vm506_vm2, %v615_v30 }
 0x294   : > { %1431 = vmatpush3.bf16.xpose.msra.mxu1 %v732_v32  ;;  %1432 = vmatprep.mubr.msk.bf16.mxu1 %vm1644_vm1, %v1643_v8 }
 0x295   : > { %1442 = vmatprep.subr.bf16.mxu1 %v1643_v8 }
 0x296   : > { %v837_v33 = vpop.permute.xlu1 %836 }
 0x297   : > { %v842_v34 = vsel %vm506_vm2, %v837_v33, 0 }
 0x29a   : > { %v835_v35 = vpop.permute.xlu1 %834 }
 0x29b   : > { %1433 = vmatmul.mubr.msk.bf16.vlgmr.msra.gmra.mxu1 %vm506_vm2, %v725_v31 }
 0x29c   : > { %1443 = vmatpush3.bf16.xpose.msra.mxu1 %v842_v34  ;;  %1444 = vmatprep.mubr.msk.bf16.mxu1 %vm1644_vm1, %v1643_v8 }
 0x29d   : > { %1454 = vmatprep.subr.bf16.mxu1 %v1643_v8 }
 0x2a3   : > { %1445 = vmatmul.mubr.msk.bf16.vlgmr.msra.gmra.mxu1 %vm506_vm2, %v835_v35 }
 0x2a4   : > { %1458 = vmatprep.mubr.msk.bf16.mxu1 %vm1644_vm1, %v1643_v8 }
 0x34f   : > { %v547_v36 = vpop.f32.mrf.mxu0 }
 0x350   : > { %v553_v37 = vsel %vm506_vm2, %v547_v36, -inf }
 0x351   : > { %554 = vmax.xlane.f32.xlu1 %v553_v37  ;;  %v1410_v38 = vpop.f32.mrf.mxu0 }
 0x353   : > { %v550_v39 = vpop.f32.mrf.mxu0  ;;  %v658_v40 = vpop.f32.mrf.mxu1 }
 0x354   : > { %v664_v41 = vsel %vm506_vm2, %v658_v40, -inf }
 0x355   : > { %665 = vmax.xlane.f32.xlu0 %v664_v41  ;;  %v1411_v42 = vpop.f32.mrf.mxu0  ;;  %v1422_v43 = vpop.f32.mrf.mxu1 }
 0x357   : > { %v661_v44 = vpop.f32.mrf.mxu1 }
 0x359   : > { %v1423_v45 = vpop.f32.mrf.mxu1 }
 0x35b   : > { %v768_v46 = vpop.f32.mrf.mxu1 }
 0x35c   : > { %v774_v47 = vsel %vm506_vm2, %v768_v46, -inf }
 0x35d   : > { %v1434_v48 = vpop.f32.mrf.mxu1  ;;  %775 = vmax.xlane.f32.xlu1 %v774_v47  ;;  %v1548_v47 = vld [vmem:[%s1994_s4] sm:$0xff]  }
 0x35f   : > { %v771_v49 = vpop.f32.mrf.mxu1 }
 0x361   : > { %v1435_v50 = vpop.f32.mrf.mxu1 }
 0x363   : > { %v878_v51 = vpop.f32.mrf.mxu1 }
 0x364   : > { %v884_v52 = vsel %vm506_vm2, %v878_v51, -inf }
 0x365   : > { %885 = vmax.xlane.f32.xlu0 %v884_v52  ;;  %v1446_v53 = vpop.f32.mrf.mxu1 }
 0x367   : > { %v881_v54 = vpop.f32.mrf.mxu1 }
 0x369   : > { %v1447_v55 = vpop.f32.mrf.mxu1 }
 0x3da   : > { %v555_v56 = vpop.xlane.xlu1 %554 }
 0x3db   : > { %v556_v57 = vsub.f32 %v547_v36, %v555_v56 }
 0x3dd   : > { %v557_v58 = vmul.f32 1.442695, %v556_v57 }
 0x3de   : > { %v666_v59 = vpop.xlane.xlu0 %665 }
 0x3df   : > { %1561 = vpow2.f32 %v557_v58  ;;  %v667_v60 = vsub.f32 %v658_v40, %v666_v59 }
 0x3e1   : > { %v668_v61 = vmul.f32 1.442695, %v667_v60 }
 0x3e3   : > { %1563 = vpow2.f32 %v668_v61 }
 0x3e6   : > { %v776_v9 = vpop.xlane.xlu1 %775 }
 0x3e7   : > { %v777_v10 = vsub.f32 %v768_v46, %v776_v9  ;;  %v1547_v46 = vld [vmem:[%s1994_s4 + $0x8] sm:$0xff]  }
 0x3e8   : > { %1455 = vmatpush3.bf16.msra.mxu1 %v1547_v46 }
 0x3e9   : > { %v778_v11 = vmul.f32 1.442695, %v777_v10  ;;  %1456 = vmatprep.subr.bf16.mxu1 %v1643_v8 }
 0x3ec   : > { %v1562_v62 = vpop.eup %1561  ;;  %1457 = vmatpush3.bf16.msra.mxu1 %v1548_v47 }
 0x3ed   : > { %v559_v63 = vsel %vm506_vm2, %v1562_v62, 0.0  ;;  %1470 = vmatprep.subr.bf16.mxu1 %v1643_v8 }
 0x3ee   : > { %v886_v1 = vpop.xlane.xlu0 %885  ;;  %560 = vadd.xlane.f32.xlu1 %v559_v63 }
 0x3ef   : > { %v887_v2 = vsub.f32 %v878_v51, %v886_v1  ;;  %v1344_v1 = vld [vmem:[%s1995_s5] ss:$0 sm:$0xff] }
 0x3f0   : > { %v1564_v3 = vpop.eup %1563 }
 0x3f1   : > { %v888_v4 = vmul.f32 1.442695, %v887_v2  ;;  %v670_v5 = vsel %vm506_vm2, %v1564_v3, 0.0 }
 0x3f2   : > { %671 = vadd.xlane.f32.xlu0 %v670_v5 }
 0x3f3   : > { %1565 = vpow2.f32 %v888_v4 }
 0x3f4   : > { %1567 = vpow2.f32 %v778_v11 }
 0x3ff   : > { %565 = vrot.lane.b32.xlu1 %v1807_v21, %s1652_s17  ;;  %s1657_s17 = smov 16  }
 0x400   : > { %v1566_v6 = vpop.eup %1565 }
 0x401   : > { %v890_v7 = vsel %vm506_vm2, %v1566_v6, 0.0  ;;  %v1568_v12 = vpop.eup %1567 }
 0x402   : > { %891 = vadd.xlane.f32.xlu0 %v890_v7  ;;  %v780_v13 = vsel %vm506_vm2, %v1568_v12, 0.0 }
 0x418   : > { %676 = vrot.lane.b32.xlu0 %v1807_v21, %s1653_s18  ;;  %s1658_s18 = smov 24  }
 0x423   : > { %781 = vadd.xlane.f32.xlu1 %v780_v13 }
 0x434   : > { %786 = vrot.lane.b32.xlu1 %v1807_v21, %s1654_s19 }
 0x438   : > { %896 = vrot.lane.b32.xlu1 %v1807_v21, %s1655_s20  ;;  %s402_s20 = sand.u32 1, %s1633_s22  }
 0x439   : > { %s1250_s25 = scalar_lea.sflag [#allocation3], %s402_s20 }
 0x477   : > { %v561_v14 = vpop.xlane.xlu1 %560 }
 0x478   : > { %1569 = vrcp.f32 %v561_v14  ;;  %v1550_v14 = vld [vmem:[%s1998_s8] sm:$0xff]  }
 0x47b   : > { %v672_v15 = vpop.xlane.xlu0 %671  ;;  %v566_v16 = vpop.permute.xlu1 %565 }
 0x47c   : > { %v572_v17 = vsel %vm570_vm3, %v566_v16, 0  ;;  %1571 = vrcp.f32 %v672_v15 }
 0x47d   : > { %1413 = vmatpush3.bf16.msra.mxu0 %v572_v17 }
 0x47e   : > { %1424 = vmatprep.subr.bf16.mxu0 %v1643_v8 }
 0x485   : > { %v1570_v18 = vpop.eup %1569 }
 0x486   : > { %v563_v19 = vmul.f32 %v1570_v18, %v1562_v62 }
 0x488   : > { %v564_v20 = vpack.c.bf16 %v563_v19, %v563_v19  ;;  %v1345_v19 = vld [vmem:[%s1996_s6] ss:$0 sm:$0xff] }
 0x489   : > { %v1572_v22 = vpop.eup %1571 }
 0x48a   : > { %1415 = vmatmul.mubr.msk.bf16.vlgmr.msra.gmra.mxu0 %vm506_vm2, %v564_v20  ;;  %v674_v21 = vmul.f32 %v1572_v22, %v1564_v3  ;;  %v1346_v22 = vld [vmem:[%s1997_s7] ss:$0 sm:$0xff] }
 0x48b   : > { %v892_v23 = vpop.xlane.xlu0 %891  ;;  %1426 = vmatprep.mubr.msk.bf16.mxu0 %vm1644_vm1, %v1643_v8 }
 0x48c   : > { %v675_v26 = vpack.c.bf16 %v674_v21, %v674_v21 }
 0x48f   : > { %v677_v24 = vpop.permute.xlu0 %676 }
 0x490   : > { %v682_v25 = vsel %vm570_vm3, %v677_v24, 0 }
 0x491   : > { %1425 = vmatpush3.bf16.msra.mxu0 %v682_v25  ;;  %v1551_v25 = vld [vmem:[%s2000_s10 + $0x38] sm:$0xff]  }
 0x492   : > { %1436 = vmatprep.subr.bf16.mxu0 %v1643_v8 }
 0x494   : > { %1427 = vmatmul.mubr.msk.bf16.vlgmr.msra.gmra.mxu0 %vm506_vm2, %v675_v26  ;;  %v1552_v26 = vld [vmem:[%s2000_s10 + $0x30] sm:$0xff]  }
 0x495   : > { %1438 = vmatprep.mubr.msk.bf16.mxu0 %vm1644_vm1, %v1643_v8 }
 0x4ac   : > { %v782_v27 = vpop.xlane.xlu1 %781 }
 0x4ad   : > { %1573 = vrcp.f32 %v782_v27  ;;  %v1553_v27 = vld [vmem:[%s2000_s10 + $0x28] sm:$0xff]  }
 0x4ae   : > { %1575 = vrcp.f32 %v892_v23 }
 0x4b0   : > { %v787_v28 = vpop.permute.xlu1 %786 }
 0x4b1   : > { %v792_v29 = vsel %vm570_vm3, %v787_v28, 0  ;;  %v1554_v28 = vld [vmem:[%s2000_s10 + $0x20] sm:$0xff]  }
 0x4b2   : > { %1437 = vmatpush3.bf16.msra.mxu0 %v792_v29  ;;  %v1555_v29 = vld [vmem:[%s2000_s10 + $0x18] sm:$0xff]  }
 0x4b3   : > { %1448 = vmatprep.subr.bf16.mxu0 %v1643_v8 }
 0x4b4   : > { %v897_v32 = vpop.permute.xlu1 %896 }
 0x4b5   : > { %v902_v35 = vsel %vm570_vm3, %v897_v32, 0  ;;  %v1558_v32 = vld [vmem:[%s2000_s10] sm:$0xff]  }
 0x4ba   : > { %v1574_v30 = vpop.eup %1573 }
 0x4bb   : > { %v784_v31 = vmul.f32 %v1574_v30, %v1568_v12  ;;  %v1576_v34 = vpop.eup %1575  ;;  %v1556_v30 = vld [vmem:[%s2000_s10 + $0x10] sm:$0xff]  }
 0x4bc   : > { %v894_v36 = vmul.f32 %v1576_v34, %v1566_v6 }
 0x4bd   : > { %v785_v33 = vpack.c.bf16 %v784_v31, %v784_v31  ;;  %v1557_v31 = vld [vmem:[%s2000_s10 + $0x8] sm:$0xff]  }
 0x4be   : > { %v895_v37 = vpack.c.bf16 %v894_v36, %v894_v36 }
 0x4bf   : > { %1439 = vmatmul.mubr.msk.bf16.vlgmr.msra.gmra.mxu0 %vm506_vm2, %v785_v33  ;;  %v1347_v33 = vld [vmem:[%s1999_s9] ss:$0 sm:$0xff] }
 0x4c0   : > { %1449 = vmatpush3.bf16.msra.mxu0 %v902_v35  ;;  %1450 = vmatprep.mubr.msk.bf16.mxu0 %vm1644_vm1, %v1643_v8 }
 0x4c1   : > { %1462 = vmatprep.subr.bf16.mxu0 %v1643_v8 }
 0x4c7   : > { %1451 = vmatmul.mubr.msk.bf16.vlgmr.msra.gmra.mxu0 %vm506_vm2, %v895_v37 }
 0x4c8   : > { %1466 = vmatprep.mubr.msk.bf16.mxu0 %vm1644_vm1, %v1643_v8 }
 0x54a   : > { %v608_v38 = vpop.f32.mrf.mxu0 }
 0x54c   : > { %v1416_v39 = vpop.f32.mrf.mxu0 }
 0x54e   : > { %v611_v40 = vpop.f32.mrf.mxu0 }
 0x550   : > { %v1417_v41 = vpop.f32.mrf.mxu0 }
 0x554   : > { %v718_v42 = vpop.f32.mrf.mxu0 }
 0x555   : > { %945 = vrot.lane.b32.xlu0 %v718_v42, %s1656_s26  ;;  %s1326_s26 = sshll.u32 %s402_s20, 3 }
 0x556   : > { %v1428_v43 = vpop.f32.mrf.mxu0  ;;  %s404_s16 = scalar_lea.vmem [#allocation2], %s1326_s26 }
 0x558   : > { %v721_v44 = vpop.f32.mrf.mxu0 }
 0x55a   : > { %v1429_v45 = vpop.f32.mrf.mxu0 }
 0x57f   : > { %v828_v48 = vpop.f32.mrf.mxu0 }
 0x580   : > { %949 = vrot.lane.b32.xlu1 %v828_v48, %s1657_s17  ;;  %v1351_v48 = vld [vmem:[%s2001_s11] ss:$0 sm:$0xff]  ;;  %s1263_s17 = sshll.u32 %s404_s16, 4  ;;  %s1950_s17 = int_to_ptr.vmem [resolvable:$true] %s1263_s17 }
 0x581   : > { %v1440_v49 = vpop.f32.mrf.mxu0  ;;  %s1581_s26 = scalar_lea.vmem %s1950_s17, 128  ;;  %p1588_p0 = scmp.lt.s32.totalorder %s1950_s17, %s1586_s29 }
 0x582   : > { %p1582_p11 = scmp.ne.s32.totalorder %s1950_s17, %s1581_s26  ;;  %p1589_p1 = scmp.lt.s32.totalorder %s1587_s15, %s1581_s26 }
 0x583   : > { %v831_v50 = vpop.f32.mrf.mxu0 }
 0x584   : > { %p1583_p12 = pnand %p1582_p11, %p1763_p5  ;;  %p1590_p2 = por %p1589_p1, %p1588_p0 }
 0x585   : > { %v1441_v51 = vpop.f32.mrf.mxu0 }
 0x586   : > { %p1584_p13 = pneg %p1583_p12 }
 0x587   : > { %v938_v52 = vpop.f32.mrf.mxu0 }
 0x588   : > { %953 = vrot.lane.b32.xlu0 %v938_v52, %s1658_s18  ;;  %p1591_p3 = pnand %p1590_p2, %p1584_p13 }
 0x589   : > { %v1452_v53 = vpop.f32.mrf.mxu0 }
 0x58b   : > { %v941_v54 = vpop.f32.mrf.mxu0 }
 0x58d   : > { %v1453_v55 = vpop.f32.mrf.mxu0 }
 0x5c7   : > { %v946_v56 = vpop.permute.xlu0 %945 }
 0x5c8   : > { %v956_v58 = vsel %vm506_vm2, %v608_v38, %v946_v56 }
 0x5f2   : > { %v950_v57 = vpop.permute.xlu1 %949 }
 0x5f3   : > { %v958_v59 = vsel %vm957_vm4, %v956_v58, %v950_v57 }
 0x5fa   : > { %v954_v60 = vpop.permute.xlu0 %953 }
 0x5fb   : > { %v960_v61 = vsel %vm959_vm5, %v958_v59, %v954_v60 }
 0x5fc   : > { %v961_v62 = vpack.c.bf16 %v960_v61, %v960_v61 }
 0x5fe   : > { %1459 = vmatmul.mubr.msk.bf16.vlgmr.msra.gmra.mxu1 %vm413_vm0, %v961_v62 }
 0x5ff   : > { %1486 = vmatprep.mubr.msk.bf16.mxu1 %vm1644_vm1, %v1643_v8  ;;  %1471 = vmatpush3.bf16.msra.mxu1 %v1551_v25 }
 0x600   : > { %1472 = vmatprep.subr.bf16.mxu1 %v1643_v8 }
 0x603   : > { %1473 = vmatpush3.bf16.msra.mxu1 %v1552_v26 }
 0x604   : > { %1474 = vmatprep.subr.bf16.mxu1 %v1643_v8 }
 0x607   : > { %1475 = vmatpush3.bf16.msra.mxu1 %v1553_v27 }
 0x608   : > { %1476 = vmatprep.subr.bf16.mxu1 %v1643_v8 }
 0x60b   : > { %1477 = vmatpush3.bf16.msra.mxu1 %v1554_v28 }
 0x60c   : > { %1478 = vmatprep.subr.bf16.mxu1 %v1643_v8 }
 0x60f   : > { %1479 = vmatpush3.bf16.msra.mxu1 %v1555_v29 }
 0x610   : > { %1480 = vmatprep.subr.bf16.mxu1 %v1643_v8 }
 0x613   : > { %1481 = vmatpush3.bf16.msra.mxu1 %v1556_v30 }
 0x614   : > { %1482 = vmatprep.subr.bf16.mxu1 %v1643_v8 }
 0x617   : > { %1483 = vmatpush3.bf16.msra.mxu1 %v1557_v31 }
 0x618   : > { %1484 = vmatprep.subr.bf16.mxu1 %v1643_v8 }
 0x61b   : > { %1485 = vmatpush3.bf16.msra.mxu1 %v1558_v32 }
 0x6be   : > { %v1015_v63 = vpop.f32.mrf.mxu1 }
 0x6bf   : > { %v1021_v2 = vadd.f32 %v1015_v63, %v1778_v0  ;;  %v1549_v0 = vld [vmem:[%s1998_s8 + $0x8] sm:$0xff]  }
 0x6c0   : > { %v1460_v3 = vpop.f32.mrf.mxu1  ;;  %1463 = vmatpush3.bf16.msra.mxu0 %v1549_v0 }
 0x6c1   : > { %v1885_v4 = vadd.f32 %v1344_v1, %v1021_v2  ;;  %1464 = vmatprep.subr.bf16.mxu0 %v1643_v8 }
 0x6c2   : > { %v1018_v5 = vpop.f32.mrf.mxu1 }
 0x6c3   : > { %v1032_v6 = vsel %vm413_vm0, %v1885_v4, 0.0 }
 0x6c4   : > { %1033 = vadd.xlane.f32.xlu1 %v1032_v6  ;;  %v1461_v7 = vpop.f32.mrf.mxu1  ;;  %1465 = vmatpush3.bf16.msra.mxu0 %v1550_v14 }
 0x74d   : > { %v1034_v9 = vpop.xlane.xlu1 %1033 }
 0x74e   : > { %v1035_v10 = vmul.f32 0.03125, %v1034_v9 }
 0x750   : > { %v1036_v11 = vsub.f32 %v1885_v4, %v1035_v10 }
 0x752   : > { %v1037_v12 = vmul.f32 %v1036_v11, %v1036_v11 }
 0x754   : > { %v1038_v13 = vsel %vm413_vm0, %v1037_v12, 0.0 }
 0x755   : > { %1039 = vadd.xlane.f32.xlu0 %v1038_v13 }
 0x7de   : > { %v1040_v15 = vpop.xlane.xlu0 %1039 }
 0x7df   : > { %v1041_v16 = vmul.f32 0.03125, %v1040_v15 }
 0x7e1   : > { %v1042_v17 = vadd.f32 1e-05, %v1041_v16 }
 0x7e3   : > { %1577 = vrsqrt.f32 %v1042_v17 }
 0x7f0   : > { %v1578_v18 = vpop.eup %1577 }
 0x7f1   : > { %v1044_v20 = vmul.f32 %v1578_v18, %v1036_v11 }
 0x7f3   : > { %v1051_v23 = vmul.f32 %v1345_v19, %v1044_v20 }
 0x7f5   : > { %v1058_v21 = vadd.f32 %v1346_v22, %v1051_v23 }
 0x7f7   : > { %v1059_v24 = vpack.c.bf16 %v1058_v21, %v1058_v21 }
 0x7f9   : > { %1467 = vmatmul.mubr.msk.bf16.vlgmr.msra.gmra.mxu0 %vm413_vm0, %v1059_v24 }
 0x8b9   : > { %v1120_v34 = vpop.f32.mrf.mxu0 }
 0x8ba   : > { %v1121_v35 = vadd.f32 %v1347_v33, %v1120_v34 }
 0x8bb   : > { %v1468_v36 = vpop.f32.mrf.mxu0 }
 0x8bc   : > { %v1127_v37 = vmul.f32 %v1121_v35, %v1121_v35  ;;  %v1126_v8 = vmul.f32 0.5, %v1121_v35 }
 0x8bd   : > { %v1123_v38 = vpop.f32.mrf.mxu0 }
 0x8be   : > { %v1128_v39 = vmul.f32 %v1127_v37, %v1121_v35 }
 0x8bf   : > { %v1469_v40 = vpop.f32.mrf.mxu0 }
 0x8c0   : > { %v1129_v41 = vmul.f32 0.044715, %v1128_v39 }
 0x8c2   : > { %v1130_v42 = vadd.f32 %v1129_v41, %v1121_v35 }
 0x8c4   : > { %v1131_v43 = vmul.f32 0.7978846, %v1130_v42 }
 0x8c6   : > { %1579 = vtanh.f32 %v1131_v43 }
 0x8d3   : > { %v1580_v44 = vpop.eup %1579 }
 0x8d4   : > { %v1133_v45 = vadd.f32 1.0, %v1580_v44 }
 0x8d6   : > { %v1134_v46 = vmul.f32 %v1133_v45, %v1126_v8 }
 0x8d8   : > { %v1135_v47 = vpack.c.bf16 %v1134_v46, %v1134_v46 }
 0x8da   : > { %1487 = vmatmul.mubr.bf16.vlgmr.msra.gmra.mxu1 %v1135_v47 }
 0x99a   : > { %v1241_v49 = vpop.f32.mrf.mxu1 }
 0x99b   : > { %v1242_v50 = vadd.f32 %v1351_v48, %v1241_v49 }
 0x99c   : > { %v1488_v51 = vpop.f32.mrf.mxu1 }
 0x99d   : > { %v1247_v52 = vadd.f32 %v1242_v50, %v1885_v4 }
 0x99e   : > { %v1244_v53 = vpop.f32.mrf.mxu1 }
 0x99f   : > { %1248 = vst.msk [vmem:[%s404_s16] sm:$0xff] %vm413_vm0, %v1247_v52 }
 0x9a0   : > { %v1489_v54 = vpop.f32.mrf.mxu1 }
 0x9a1   : > { %1594 = shalt.err (!%p1591_p3)
}
 0x9a2   : > { %s1595_s16 = scalar_lea.hbm %s1948_s0, 128  ;;  %s1599_s19 = scalar_lea.hbm %s2002_s12, 256 }
 0x9a3   : > { %p1596_p4 = scmp.ne.s32.totalorder %s1948_s0, %s1595_s16  ;;  %p1600_p9 = scmp.lt.s32.totalorder %s1948_s0, %s2002_s12 }
 0x9a4   : > { %p1601_p10 = scmp.lt.s32.totalorder %s1599_s19, %s1595_s16 }
 0x9a5   : > { %p1597_p7 = pnand %p1596_p4, %p1763_p5 }
 0x9a6   : > { %p1602_p11 = por %p1601_p10, %p1600_p9 }
 0x9a7   : > { %p1598_p8 = pneg %p1597_p7 }
 0x9a9   : > { %p1603_p12 = pnand %p1602_p11, %p1598_p8 }
 0x9ab   : > { %1606 = shalt.err (!%p1603_p12)
}
 0x9ac   : > { %1490 = dma.vmem_to_hbm [thread:$0]  (%p1763_p5), %s1950_s17, 128, %s1948_s0, %s1250_s25  }
 0x9ad PF: > { %p1496_p13 = scmp.ge.s32.totalorder %s1641_s24, 2  ;;  %s1275_s26 = sand.u32 1, %s1629_s21  }
 0x9ae   : > { %s1276_s1 = scalar_lea.sflag [#allocation3], %s1275_s26 }
 0x9af   : > { %p1493_p0 = pnand %p1496_p13, %p1767_p6 }
 0x9b1   : > { %p1494_p1 = pneg %p1493_p0 }
 0x9b3   : > { %1624 = dma.done.wait (%p1494_p1), %s1276_s1, 128  }
 0x9b4   : > { %1626 = vsyncadd (%p1494_p1), %s1276_s1, 4294967168  ;;  %p22_p2 = scmp.ge.s32.totalorder %s1750_s27, 4   ;;  %s2009_s21 = smov %s1633_s22 }
 0x9b5   : > { %s2010_s22 = smov %s1637_s23  ;;  %s2011_s23 = smov %s1761_s30 }
 0x9b6   : > { %s2012_s24 = smov %s1750_s27  ;;  %24 = sbr.rel (!%p22_p2) target bundleno = 6 (0x6), region = 103 }
 0x9bb   :  { %1281 = vsyncpa [#allocation3], 1 }
 0x9bc   :  { %1283 = vsyncpa [#allocation3 + $0x1], 1 }

// kernel: tpu_custom_call.1
= control target key start
LH: loop header
LB: loop body
LE: loop exit
PB: predicated region body
PF: predicated region fallthrough
CT: control target
= control target key end

     0   :  { %s1990_s0 = inlined_call_operand.vmem [shape: f32[2,8,32], index: 0, kind: input, shape index: {}]   ;;  %s1991_s1 = inlined_call_operand.vmem [shape: f32[1,32], index: 1, kind: input, shape index: {}]   ;;  %s1992_s2 = inlined_call_operand.vmem [shape: f32[1,32], index: 2, kind: input, shape index: {}]   ;;  %s1993_s3 = inlined_call_operand.vmem [shape: bf16[1,32,96], index: 3, kind: input, shape index: {}]   ;;  %s1994_s4 = inlined_call_operand.vmem [shape: bf16[1,32,32], index: 4, kind: input, shape index: {}]   ;;  %s1995_s5 = inlined_call_operand.vmem [shape: f32[1,32], index: 5, kind: input, shape index: {}]   ;;  %s1996_s6 = inlined_call_operand.vmem [shape: f32[1,32], index: 6, kind: input, shape index: {}]   ;;  %s1997_s7 = inlined_call_operand.vmem [shape: f32[1,32], index: 7, kind: input, shape index: {}]   ;;  %s1998_s8 = inlined_call_operand.vmem [shape: bf16[32,128], index: 8, kind: input, shape index: {}]   ;;  %s1999_s9 = inlined_call_operand.vmem [shape: f32[1,128], index: 9, kind: input, shape index: {}]   ;;  %s2000_s10 = inlined_call_operand.vmem [shape: bf16[128,32], index: 10, kind: input, shape index: {}]   ;;  %s2001_s11 = inlined_call_operand.vmem [shape: f32[1,32], index: 11, kind: input, shape index: {}]   ;;  %s2002_s12 = inlined_call_operand.hbm [shape: f32[2,8,32], index: 12, kind: output, shape index: {}]  }
   0x1   :  { %2003 = sst [smem:[#allocation5_spill]] %s1990_s0 }
   0x2   :  { %2004 = sst [smem:[#allocation6_spill]] %s1991_s1 }
   0x3   :  { %17 = vsyncpa [#allocation3], 0 }
   0x4   :  { %19 = vsyncpa [#allocation3 + $0x1], 0  ;;  %s1725_s21 = smov 0   ;;  %s1727_s22 = smov 0  }
   0x5   :  { %s1729_s23 = smov 0   ;;  %s1731_s24 = smov 0  }
   0x6 LB: > { %s1746_s25 = sadd.s32 4294967295, %s1641_s24   ;;  %s1322_s26 = sadd.s32 4294967294, %s1641_s24   ;;  %s1641_s24 = sphi %s1731_s24, %s2012_s24   ;;  %s1637_s23 = sphi %s1729_s23, %s2011_s23   ;;  %s1633_s22 = sphi %s1727_s22, %s2010_s22   ;;  %s1629_s21 = sphi %s1725_s21, %s2009_s21  }
   0x7   : > { %s1750_s27 = sadd.s32 1, %s1641_s24   ;;  %s289_s28 = sadd.s32 1, %s1637_s23 }
   0x8   : > { %s286_s29 = ssub.s32 %s1641_s24, %s1750_s27  ;;  %p299_p0 = scmp.ne.s32.totalorder %s1637_s23, %s1633_s22 }
   0x9   : > { %p287_p1 = scmp.eq.s32.totalorder %s286_s29, 0  ;;  %p300_p2 = scmp.eq.s32.totalorder %s1746_s25, 1 }
   0xa   : > { %p305_p3 = scmp.ne.s32.totalorder %s1633_s22, %s1629_s21  ;;  %p306_p4 = scmp.eq.s32.totalorder %s1322_s26, 1 }
   0xb   : > { %s1761_s30 = scalar_select %p287_p1, %s1637_s23, %s289_s28  }
   0xc   : > { %p1763_p5 = por %p300_p2, %p299_p0  ;;  %p1767_p6 = por %p306_p4, %p305_p3 }
   0xd   : > { %p1325_p7 = scmp.ge.s32.totalorder %s1641_s24, 1  ;;  %p364_p8 = scmp.lt.s32.totalorder %s1641_s24, 3 }
   0xf   : > { %p365_p9 = pnand %p1325_p7, %p364_p8 }
  0x10   : > { %p405_p10 = scmp.lt.s32.totalorder (!%p365_p9), %s1746_s25, 1  ;;  %s2007_s0 = sld [smem:[#allocation5_spill]] (!%p365_p9) }
  0x11   : > { %368 = sbr.rel (%p365_p9) target bundleno = 2477 (0x9ad), region = 68  ;;  %s2008_s1 = sld [smem:[#allocation6_spill]] (!%p365_p9) }
  0x12   : > { %s1646_s20 = smov (!%p365_p9), 96   ;;  %s1647_s26 = smov (!%p365_p9), 88  }
  0x13   : > { %s1648_s28 = smov (!%p365_p9), 80   ;;  %s1649_s29 = smov (!%p365_p9), 112  }
  0x14   : > { %s1652_s17 = smov (!%p365_p9), 64   ;;  %s1653_s18 = smov (!%p365_p9), 56  }
  0x16   : > { %s406_s15 = scalar_select %p405_p10, %s1746_s25, 1  ;;  %vm413_vm0 = vcmask 261120   ;;  %v1545_v7 = vld [vmem:[%s1993_s3 + $0x8] sm:$0xff]   ;;  %v1643_v8 = vmov 0.0   ;;  %vm1644_vm1 = vmmov 0   ;;  %v1546_v9 = vld [vmem:[%s1993_s3] sm:$0xff]  }
  0x17   : > { %1398 = vmatprep.subr.bf16.mxu0 %v1643_v8  ;;  %1402 = vmatprep.mubr.msk.bf16.mxu0 %vm1644_vm1, %v1643_v8  ;;  %v1328_v14 = vld [vmem:[%s2008_s1] ss:$0 sm:$0xff]  ;;  %vm506_vm2 = vcmask 64512   ;;  %vm570_vm3 = vcmask 1043456   ;;  %vm957_vm4 = vcmask 130048   ;;  %vm959_vm5 = vcmask 195584  }
  0x18   : > { %s1327_s16 = sshll.u32 %s406_s15, 3  ;;  %1399 = vmatpush3.bf16.msra.mxu0 %v1545_v7  ;;  %1418 = vmatprep.subr.bf16.mxu1 %v1643_v8  ;;  %v1329_v16 = vld [vmem:[%s1992_s2] ss:$0 sm:$0xff]  ;;  %s1650_s15 = smov 72  }
  0x19   : > { %s408_s19 = scalar_lea.vmem %s2007_s0, %s1327_s16  ;;  %1400 = vmatprep.subr.bf16.mxu0 %v1643_v8  ;;  %1420 = vmatprep.mubr.msk.bf16.mxu1 %vm1644_vm1, %v1643_v8  ;;  %s1651_s16 = smov 104  }
  0x1a   : > { %v1778_v0 = vld [vmem:[%s408_s19] sm:$0xff]  ;;  %s1645_s19 = smov 120  }
  0x1b   : > { %v414_v1 = vsel %vm413_vm0, %v1778_v0, 0.0 }
  0x1c   : > { %415 = vadd.xlane.f32.xlu0 %v414_v1  ;;  %1401 = vmatpush3.bf16.msra.mxu0 %v1546_v9 }
  0x1d   : > { %1406 = vmatprep.subr.bf16.mxu0 %v1643_v8 }
  0xa5   : > { %v416_v2 = vpop.xlane.xlu0 %415 }
  0xa6   : > { %v418_v3 = vmul.f32 0.03125, %v416_v2 }
  0xa8   : > { %v419_v4 = vsub.f32 %v1778_v0, %v418_v3 }
  0xaa   : > { %v420_v5 = vmul.f32 %v419_v4, %v419_v4 }
  0xac   : > { %v421_v6 = vsel %vm413_vm0, %v420_v5, 0.0 }
  0xad   : > { %422 = vadd.xlane.f32.xlu0 %v421_v6 }
 0x136   : > { %v423_v10 = vpop.xlane.xlu0 %422 }
 0x137   : > { %v424_v11 = vmul.f32 0.03125, %v423_v10 }
 0x139   : > { %v425_v12 = vadd.f32 1e-05, %v424_v11 }
 0x13b   : > { %1559 = vrsqrt.f32 %v425_v12 }
 0x148   : > { %v1560_v13 = vpop.eup %1559 }
 0x149   : > { %v427_v15 = vmul.f32 %v1560_v13, %v419_v4 }
 0x14b   : > { %v434_v17 = vmul.f32 %v1328_v14, %v427_v15 }
 0x14d   : > { %v441_v18 = vadd.f32 %v1329_v16, %v434_v17 }
 0x14f   : > { %v442_v19 = vpack.c.bf16 %v441_v18, %v441_v18 }
 0x151   : > { %1403 = vmatmul.mubr.msk.bf16.vlgmr.msra.gmra.mxu0 %vm413_vm0, %v442_v19 }
 0x152   : > { %1408 = vmatprep.mubr.msk.bf16.mxu0 %vm1644_vm1, %v1643_v8 }
 0x211   : > { %v496_v20 = vpop.f32.mrf.mxu0 }
 0x212   : > { %v1807_v21 = vpack.c.bf16 %v496_v20, %v496_v20 }
 0x213   : > { %v1404_v22 = vpop.f32.mrf.mxu0 }
 0x214   : > { %614 = vrot.lane.b32.xlu0 %v1807_v21, %s1645_s19  ;;  %504 = vrot.lane.b32.xlu1 %v1807_v21, %s1646_s20  ;;  %s1654_s19 = smov 48   ;;  %s1655_s20 = smov 40  }
 0x215   : > { %v499_v23 = vpop.f32.mrf.mxu0 }
 0x217   : > { %v1405_v24 = vpop.f32.mrf.mxu0 }
 0x218   : > { %616 = vrot.lane.b32.xlu1 %v1807_v21, %s1647_s26  ;;  %s1656_s26 = smov 8  }
 0x21c   : > { %726 = vrot.lane.b32.xlu1 %v1807_v21, %s1648_s28  ;;  %s1659_s28 = smov [#allocation2]  }
 0x220   : > { %724 = vrot.lane.b32.xlu1 %v1807_v21, %s1649_s29  ;;  %s1585_s29 = sshll.u32 %s1659_s28, 4  ;;  %s1586_s29 = int_to_ptr.vmem [resolvable:$false] %s1585_s29 }
 0x224   : > { %836 = vrot.lane.b32.xlu1 %v1807_v21, %s1650_s15  ;;  %s1361_s15 = sshll.u32 %s1746_s25, 7 }
 0x225   : > { %s1948_s0 = scalar_lea.hbm %s2002_s12, %s1361_s15  ;;  %s1587_s15 = scalar_lea.vmem %s1586_s29, 256 }
 0x228   : > { %834 = vrot.lane.b32.xlu1 %v1807_v21, %s1651_s16 }
 0x286   : > { %v505_v25 = vpop.permute.xlu1 %504  ;;  %v615_v30 = vpop.permute.xlu0 %614 }
 0x287   : > { %v511_v26 = vsel %vm506_vm2, %v505_v25, 0 }
 0x288   : > { %1407 = vmatpush3.bf16.xpose.msra.mxu0 %v511_v26 }
 0x289   : > { %1412 = vmatprep.subr.bf16.mxu0 %v1643_v8 }
 0x28a   : > { %v617_v27 = vpop.permute.xlu1 %616 }
 0x28b   : > { %v622_v28 = vsel %vm506_vm2, %v617_v27, 0 }
 0x28c   : > { %1419 = vmatpush3.bf16.xpose.msra.mxu1 %v622_v28 }
 0x28d   : > { %1430 = vmatprep.subr.bf16.mxu1 %v1643_v8 }
 0x28e   : > { %v727_v29 = vpop.permute.xlu1 %726 }
 0x28f   : > { %1409 = vmatmul.mubr.msk.bf16.vlgmr.msra.gmra.mxu0 %vm506_vm2, %v1807_v21  ;;  %v732_v32 = vsel %vm506_vm2, %v727_v29, 0 }
 0x290   : > { %1414 = vmatprep.mubr.msk.bf16.mxu0 %vm1644_vm1, %v1643_v8 }
 0x292   : > { %v725_v31 = vpop.permute.xlu1 %724 }
 0x293   : > { %1421 = vmatmul.mubr.msk.bf16.vlgmr.msra.gmra.mxu1 %vm506_vm2, %v615_v30 }
 0x294   : > { %1431 = vmatpush3.bf16.xpose.msra.mxu1 %v732_v32  ;;  %1432 = vmatprep.mubr.msk.bf16.mxu1 %vm1644_vm1, %v1643_v8 }
 0x295   : > { %1442 = vmatprep.subr.bf16.mxu1 %v1643_v8 }
 0x296   : > { %v837_v33 = vpop.permute.xlu1 %836 }
 0x297   : > { %v842_v34 = vsel %vm506_vm2, %v837_v33, 0 }
 0x29a   : > { %v835_v35 = vpop.permute.xlu1 %834 }
 0x29b   : > { %1433 = vmatmul.mubr.msk.bf16.vlgmr.msra.gmra.mxu1 %vm506_vm2, %v725_v31 }
 0x29c   : > { %1443 = vmatpush3.bf16.xpose.msra.mxu1 %v842_v34  ;;  %1444 = vmatprep.mubr.msk.bf16.mxu1 %vm1644_vm1, %v1643_v8 }
 0x29d   : > { %1454 = vmatprep.subr.bf16.mxu1 %v1643_v8 }
 0x2a3   : > { %1445 = vmatmul.mubr.msk.bf16.vlgmr.msra.gmra.mxu1 %vm506_vm2, %v835_v35 }
 0x2a4   : > { %1458 = vmatprep.mubr.msk.bf16.mxu1 %vm1644_vm1, %v1643_v8 }
 0x34f   : > { %v547_v36 = vpop.f32.mrf.mxu0 }
 0x350   : > { %v553_v37 = vsel %vm506_vm2, %v547_v36, -inf }
 0x351   : > { %554 = vmax.xlane.f32.xlu1 %v553_v37  ;;  %v1410_v38 = vpop.f32.mrf.mxu0 }
 0x353   : > { %v550_v39 = vpop.f32.mrf.mxu0  ;;  %v658_v40 = vpop.f32.mrf.mxu1 }
 0x354   : > { %v664_v41 = vsel %vm506_vm2, %v658_v40, -inf }
 0x355   : > { %665 = vmax.xlane.f32.xlu0 %v664_v41  ;;  %v1411_v42 = vpop.f32.mrf.mxu0  ;;  %v1422_v43 = vpop.f32.mrf.mxu1 }
 0x357   : > { %v661_v44 = vpop.f32.mrf.mxu1 }
 0x359   : > { %v1423_v45 = vpop.f32.mrf.mxu1 }
 0x35b   : > { %v768_v46 = vpop.f32.mrf.mxu1 }
 0x35c   : > { %v774_v47 = vsel %vm506_vm2, %v768_v46, -inf }
 0x35d   : > { %v1434_v48 = vpop.f32.mrf.mxu1  ;;  %775 = vmax.xlane.f32.xlu1 %v774_v47  ;;  %v1548_v47 = vld [vmem:[%s1994_s4] sm:$0xff]  }
 0x35f   : > { %v771_v49 = vpop.f32.mrf.mxu1 }
 0x361   : > { %v1435_v50 = vpop.f32.mrf.mxu1 }
 0x363   : > { %v878_v51 = vpop.f32.mrf.mxu1 }
 0x364   : > { %v884_v52 = vsel %vm506_vm2, %v878_v51, -inf }
 0x365   : > { %885 = vmax.xlane.f32.xlu0 %v884_v52  ;;  %v1446_v53 = vpop.f32.mrf.mxu1 }
 0x367   : > { %v881_v54 = vpop.f32.mrf.mxu1 }
 0x369   : > { %v1447_v55 = vpop.f32.mrf.mxu1 }
 0x3da   : > { %v555_v56 = vpop.xlane.xlu1 %554 }
 0x3db   : > { %v556_v57 = vsub.f32 %v547_v36, %v555_v56 }
 0x3dd   : > { %v557_v58 = vmul.f32 1.442695, %v556_v57 }
 0x3de   : > { %v666_v59 = vpop.xlane.xlu0 %665 }
 0x3df   : > { %1561 = vpow2.f32 %v557_v58  ;;  %v667_v60 = vsub.f32 %v658_v40, %v666_v59 }
 0x3e1   : > { %v668_v61 = vmul.f32 1.442695, %v667_v60 }
 0x3e3   : > { %1563 = vpow2.f32 %v668_v61 }
 0x3e6   : > { %v776_v9 = vpop.xlane.xlu1 %775 }
 0x3e7   : > { %v777_v10 = vsub.f32 %v768_v46, %v776_v9  ;;  %v1547_v46 = vld [vmem:[%s1994_s4 + $0x8] sm:$0xff]  }
 0x3e8   : > { %1455 = vmatpush3.bf16.msra.mxu1 %v1547_v46 }
 0x3e9   : > { %v778_v11 = vmul.f32 1.442695, %v777_v10  ;;  %1456 = vmatprep.subr.bf16.mxu1 %v1643_v8 }
 0x3ec   : > { %v1562_v62 = vpop.eup %1561  ;;  %1457 = vmatpush3.bf16.msra.mxu1 %v1548_v47 }
 0x3ed   : > { %v559_v63 = vsel %vm506_vm2, %v1562_v62, 0.0  ;;  %1470 = vmatprep.subr.bf16.mxu1 %v1643_v8 }
 0x3ee   : > { %v886_v1 = vpop.xlane.xlu0 %885  ;;  %560 = vadd.xlane.f32.xlu1 %v559_v63 }
 0x3ef   : > { %v887_v2 = vsub.f32 %v878_v51, %v886_v1  ;;  %v1344_v1 = vld [vmem:[%s1995_s5] ss:$0 sm:$0xff] }
 0x3f0   : > { %v1564_v3 = vpop.eup %1563 }
 0x3f1   : > { %v888_v4 = vmul.f32 1.442695, %v887_v2  ;;  %v670_v5 = vsel %vm506_vm2, %v1564_v3, 0.0 }
 0x3f2   : > { %671 = vadd.xlane.f32.xlu0 %v670_v5 }
 0x3f3   : > { %1565 = vpow2.f32 %v888_v4 }
 0x3f4   : > { %1567 = vpow2.f32 %v778_v11 }
 0x3ff   : > { %565 = vrot.lane.b32.xlu1 %v1807_v21, %s1652_s17  ;;  %s1657_s17 = smov 16  }
 0x400   : > { %v1566_v6 = vpop.eup %1565 }
 0x401   : > { %v890_v7 = vsel %vm506_vm2, %v1566_v6, 0.0  ;;  %v1568_v12 = vpop.eup %1567 }
 0x402   : > { %891 = vadd.xlane.f32.xlu0 %v890_v7  ;;  %v780_v13 = vsel %vm506_vm2, %v1568_v12, 0.0 }
 0x418   : > { %676 = vrot.lane.b32.xlu0 %v1807_v21, %s1653_s18  ;;  %s1658_s18 = smov 24  }
 0x423   : > { %781 = vadd.xlane.f32.xlu1 %v780_v13 }
 0x434   : > { %786 = vrot.lane.b32.xlu1 %v1807_v21, %s1654_s19 }
 0x438   : > { %896 = vrot.lane.b32.xlu1 %v1807_v21, %s1655_s20  ;;  %s402_s20 = sand.u32 1, %s1633_s22  }
 0x439   : > { %s1250_s25 = scalar_lea.sflag [#allocation3], %s402_s20 }
 0x477   : > { %v561_v14 = vpop.xlane.xlu1 %560 }
 0x478   : > { %1569 = vrcp.f32 %v561_v14  ;;  %v1550_v14 = vld [vmem:[%s1998_s8] sm:$0xff]  }
 0x47b   : > { %v672_v15 = vpop.xlane.xlu0 %671  ;;  %v566_v16 = vpop.permute.xlu1 %565 }
 0x47c   : > { %v572_v17 = vsel %vm570_vm3, %v566_v16, 0  ;;  %1571 = vrcp.f32 %v672_v15 }
 0x47d   : > { %1413 = vmatpush3.bf16.msra.mxu0 %v572_v17 }
 0x47e   : > { %1424 = vmatprep.subr.bf16.mxu0 %v1643_v8 }
 0x485   : > { %v1570_v18 = vpop.eup %1569 }
 0x486   : > { %v563_v19 = vmul.f32 %v1570_v18, %v1562_v62 }
 0x488   : > { %v564_v20 = vpack.c.bf16 %v563_v19, %v563_v19  ;;  %v1345_v19 = vld [vmem:[%s1996_s6] ss:$0 sm:$0xff] }
 0x489   : > { %v1572_v22 = vpop.eup %1571 }
 0x48a   : > { %1415 = vmatmul.mubr.msk.bf16.vlgmr.msra.gmra.mxu0 %vm506_vm2, %v564_v20  ;;  %v674_v21 = vmul.f32 %v1572_v22, %v1564_v3  ;;  %v1346_v22 = vld [vmem:[%s1997_s7] ss:$0 sm:$0xff] }
 0x48b   : > { %v892_v23 = vpop.xlane.xlu0 %891  ;;  %1426 = vmatprep.mubr.msk.bf16.mxu0 %vm1644_vm1, %v1643_v8 }
 0x48c   : > { %v675_v26 = vpack.c.bf16 %v674_v21, %v674_v21 }
 0x48f   : > { %v677_v24 = vpop.permute.xlu0 %676 }
 0x490   : > { %v682_v25 = vsel %vm570_vm3, %v677_v24, 0 }
 0x491   : > { %1425 = vmatpush3.bf16.msra.mxu0 %v682_v25  ;;  %v1551_v25 = vld [vmem:[%s2000_s10 + $0x38] sm:$0xff]  }
 0x492   : > { %1436 = vmatprep.subr.bf16.mxu0 %v1643_v8 }
 0x494   : > { %1427 = vmatmul.mubr.msk.bf16.vlgmr.msra.gmra.mxu0 %vm506_vm2, %v675_v26  ;;  %v1552_v26 = vld [vmem:[%s2000_s10 + $0x30] sm:$0xff]  }
 0x495   : > { %1438 = vmatprep.mubr.msk.bf16.mxu0 %vm1644_vm1, %v1643_v8 }
 0x4ac   : > { %v782_v27 = vpop.xlane.xlu1 %781 }
 0x4ad   : > { %1573 = vrcp.f32 %v782_v27  ;;  %v1553_v27 = vld [vmem:[%s2000_s10 + $0x28] sm:$0xff]  }
 0x4ae   : > { %1575 = vrcp.f32 %v892_v23 }
 0x4b0   : > { %v787_v28 = vpop.permute.xlu1 %786 }
 0x4b1   : > { %v792_v29 = vsel %vm570_vm3, %v787_v28, 0  ;;  %v1554_v28 = vld [vmem:[%s2000_s10 + $0x20] sm:$0xff]  }
 0x4b2   : > { %1437 = vmatpush3.bf16.msra.mxu0 %v792_v29  ;;  %v1555_v29 = vld [vmem:[%s2000_s10 + $0x18] sm:$0xff]  }
 0x4b3   : > { %1448 = vmatprep.subr.bf16.mxu0 %v1643_v8 }
 0x4b4   : > { %v897_v32 = vpop.permute.xlu1 %896 }
 0x4b5   : > { %v902_v35 = vsel %vm570_vm3, %v897_v32, 0  ;;  %v1558_v32 = vld [vmem:[%s2000_s10] sm:$0xff]  }
 0x4ba   : > { %v1574_v30 = vpop.eup %1573 }
 0x4bb   : > { %v784_v31 = vmul.f32 %v1574_v30, %v1568_v12  ;;  %v1576_v34 = vpop.eup %1575  ;;  %v1556_v30 = vld [vmem:[%s2000_s10 + $0x10] sm:$0xff]  }
 0x4bc   : > { %v894_v36 = vmul.f32 %v1576_v34, %v1566_v6 }
 0x4bd   : > { %v785_v33 = vpack.c.bf16 %v784_v31, %v784_v31  ;;  %v1557_v31 = vld [vmem:[%s2000_s10 + $0x8] sm:$0xff]  }
 0x4be   : > { %v895_v37 = vpack.c.bf16 %v894_v36, %v894_v36 }
 0x4bf   : > { %1439 = vmatmul.mubr.msk.bf16.vlgmr.msra.gmra.mxu0 %vm506_vm2, %v785_v33  ;;  %v1347_v33 = vld [vmem:[%s1999_s9] ss:$0 sm:$0xff] }
 0x4c0   : > { %1449 = vmatpush3.bf16.msra.mxu0 %v902_v35  ;;  %1450 = vmatprep.mubr.msk.bf16.mxu0 %vm1644_vm1, %v1643_v8 }
 0x4c1   : > { %1462 = vmatprep.subr.bf16.mxu0 %v1643_v8 }
 0x4c7   : > { %1451 = vmatmul.mubr.msk.bf16.vlgmr.msra.gmra.mxu0 %vm506_vm2, %v895_v37 }
 0x4c8   : > { %1466 = vmatprep.mubr.msk.bf16.mxu0 %vm1644_vm1, %v1643_v8 }
 0x54a   : > { %v608_v38 = vpop.f32.mrf.mxu0 }
 0x54c   : > { %v1416_v39 = vpop.f32.mrf.mxu0 }
 0x54e   : > { %v611_v40 = vpop.f32.mrf.mxu0 }
 0x550   : > { %v1417_v41 = vpop.f32.mrf.mxu0 }
 0x554   : > { %v718_v42 = vpop.f32.mrf.mxu0 }
 0x555   : > { %945 = vrot.lane.b32.xlu0 %v718_v42, %s1656_s26  ;;  %s1326_s26 = sshll.u32 %s402_s20, 3 }
 0x556   : > { %v1428_v43 = vpop.f32.mrf.mxu0  ;;  %s404_s16 = scalar_lea.vmem [#allocation2], %s1326_s26 }
 0x558   : > { %v721_v44 = vpop.f32.mrf.mxu0 }
 0x55a   : > { %v1429_v45 = vpop.f32.mrf.mxu0 }
 0x57f   : > { %v828_v48 = vpop.f32.mrf.mxu0 }
 0x580   : > { %949 = vrot.lane.b32.xlu1 %v828_v48, %s1657_s17  ;;  %v1351_v48 = vld [vmem:[%s2001_s11] ss:$0 sm:$0xff]  ;;  %s1263_s17 = sshll.u32 %s404_s16, 4  ;;  %s1950_s17 = int_to_ptr.vmem [resolvable:$true] %s1263_s17 }
 0x581   : > { %v1440_v49 = vpop.f32.mrf.mxu0  ;;  %s1581_s26 = scalar_lea.vmem %s1950_s17, 128  ;;  %p1588_p0 = scmp.lt.s32.totalorder %s1950_s17, %s1586_s29 }
 0x582   : > { %p1582_p11 = scmp.ne.s32.totalorder %s1950_s17, %s1581_s26  ;;  %p1589_p1 = scmp.lt.s32.totalorder %s1587_s15, %s1581_s26 }
 0x583   : > { %v831_v50 = vpop.f32.mrf.mxu0 }
 0x584   : > { %p1583_p12 = pnand %p1582_p11, %p1763_p5  ;;  %p1590_p2 = por %p1589_p1, %p1588_p0 }
 0x585   : > { %v1441_v51 = vpop.f32.mrf.mxu0 }
 0x586   : > { %p1584_p13 = pneg %p1583_p12 }
 0x587   : > { %v938_v52 = vpop.f32.mrf.mxu0 }
 0x588   : > { %953 = vrot.lane.b32.xlu0 %v938_v52, %s1658_s18  ;;  %p1591_p3 = pnand %p1590_p2, %p1584_p13 }
 0x589   : > { %v1452_v53 = vpop.f32.mrf.mxu0 }
 0x58b   : > { %v941_v54 = vpop.f32.mrf.mxu0 }
 0x58d   : > { %v1453_v55 = vpop.f32.mrf.mxu0 }
 0x5c7   : > { %v946_v56 = vpop.permute.xlu0 %945 }
 0x5c8   : > { %v956_v58 = vsel %vm506_vm2, %v608_v38, %v946_v56 }
 0x5f2   : > { %v950_v57 = vpop.permute.xlu1 %949 }
 0x5f3   : > { %v958_v59 = vsel %vm957_vm4, %v956_v58, %v950_v57 }
 0x5fa   : > { %v954_v60 = vpop.permute.xlu0 %953 }
 0x5fb   : > { %v960_v61 = vsel %vm959_vm5, %v958_v59, %v954_v60 }
 0x5fc   : > { %v961_v62 = vpack.c.bf16 %v960_v61, %v960_v61 }
 0x5fe   : > { %1459 = vmatmul.mubr.msk.bf16.vlgmr.msra.gmra.mxu1 %vm413_vm0, %v961_v62 }
 0x5ff   : > { %1486 = vmatprep.mubr.msk.bf16.mxu1 %vm1644_vm1, %v1643_v8  ;;  %1471 = vmatpush3.bf16.msra.mxu1 %v1551_v25 }
 0x600   : > { %1472 = vmatprep.subr.bf16.mxu1 %v1643_v8 }
 0x603   : > { %1473 = vmatpush3.bf16.msra.mxu1 %v1552_v26 }
 0x604   : > { %1474 = vmatprep.subr.bf16.mxu1 %v1643_v8 }
 0x607   : > { %1475 = vmatpush3.bf16.msra.mxu1 %v1553_v27 }
 0x608   : > { %1476 = vmatprep.subr.bf16.mxu1 %v1643_v8 }
 0x60b   : > { %1477 = vmatpush3.bf16.msra.mxu1 %v1554_v28 }
 0x60c   : > { %1478 = vmatprep.subr.bf16.mxu1 %v1643_v8 }
 0x60f   : > { %1479 = vmatpush3.bf16.msra.mxu1 %v1555_v29 }
 0x610   : > { %1480 = vmatprep.subr.bf16.mxu1 %v1643_v8 }
 0x613   : > { %1481 = vmatpush3.bf16.msra.mxu1 %v1556_v30 }
 0x614   : > { %1482 = vmatprep.subr.bf16.mxu1 %v1643_v8 }
 0x617   : > { %1483 = vmatpush3.bf16.msra.mxu1 %v1557_v31 }
 0x618   : > { %1484 = vmatprep.subr.bf16.mxu1 %v1643_v8 }
 0x61b   : > { %1485 = vmatpush3.bf16.msra.mxu1 %v1558_v32 }
 0x6be   : > { %v1015_v63 = vpop.f32.mrf.mxu1 }
 0x6bf   : > { %v1021_v2 = vadd.f32 %v1015_v63, %v1778_v0  ;;  %v1549_v0 = vld [vmem:[%s1998_s8 + $0x8] sm:$0xff]  }
 0x6c0   : > { %v1460_v3 = vpop.f32.mrf.mxu1  ;;  %1463 = vmatpush3.bf16.msra.mxu0 %v1549_v0 }
 0x6c1   : > { %v1885_v4 = vadd.f32 %v1344_v1, %v1021_v2  ;;  %1464 = vmatprep.subr.bf16.mxu0 %v1643_v8 }
 0x6c2   : > { %v1018_v5 = vpop.f32.mrf.mxu1 }
 0x6c3   : > { %v1032_v6 = vsel %vm413_vm0, %v1885_v4, 0.0 }
 0x6c4   : > { %1033 = vadd.xlane.f32.xlu1 %v1032_v6  ;;  %v1461_v7 = vpop.f32.mrf.mxu1  ;;  %1465 = vmatpush3.bf16.msra.mxu0 %v1550_v14 }
 0x74d   : > { %v1034_v9 = vpop.xlane.xlu1 %1033 }
 0x74e   : > { %v1035_v10 = vmul.f32 0.03125, %v1034_v9 }
 0x750   : > { %v1036_v11 = vsub.f32 %v1885_v4, %v1035_v10 }
 0x752   : > { %v1037_v12 = vmul.f32 %v1036_v11, %v1036_v11 }
 0x754   : > { %v1038_v13 = vsel %vm413_vm0, %v1037_v12, 0.0 }
 0x755   : > { %1039 = vadd.xlane.f32.xlu0 %v1038_v13 }
 0x7de   : > { %v1040_v15 = vpop.xlane.xlu0 %1039 }
 0x7df   : > { %v1041_v16 = vmul.f32 0.03125, %v1040_v15 }
 0x7e1   : > { %v1042_v17 = vadd.f32 1e-05, %v1041_v16 }
 0x7e3   : > { %1577 = vrsqrt.f32 %v1042_v17 }
 0x7f0   : > { %v1578_v18 = vpop.eup %1577 }
 0x7f1   : > { %v1044_v20 = vmul.f32 %v1578_v18, %v1036_v11 }
 0x7f3   : > { %v1051_v23 = vmul.f32 %v1345_v19, %v1044_v20 }
 0x7f5   : > { %v1058_v21 = vadd.f32 %v1346_v22, %v1051_v23 }
 0x7f7   : > { %v1059_v24 = vpack.c.bf16 %v1058_v21, %v1058_v21 }
 0x7f9   : > { %1467 = vmatmul.mubr.msk.bf16.vlgmr.msra.gmra.mxu0 %vm413_vm0, %v1059_v24 }
 0x8b9   : > { %v1120_v34 = vpop.f32.mrf.mxu0 }
 0x8ba   : > { %v1121_v35 = vadd.f32 %v1347_v33, %v1120_v34 }
 0x8bb   : > { %v1468_v36 = vpop.f32.mrf.mxu0 }
 0x8bc   : > { %v1127_v37 = vmul.f32 %v1121_v35, %v1121_v35  ;;  %v1126_v8 = vmul.f32 0.5, %v1121_v35 }
 0x8bd   : > { %v1123_v38 = vpop.f32.mrf.mxu0 }
 0x8be   : > { %v1128_v39 = vmul.f32 %v1127_v37, %v1121_v35 }
 0x8bf   : > { %v1469_v40 = vpop.f32.mrf.mxu0 }
 0x8c0   : > { %v1129_v41 = vmul.f32 0.044715, %v1128_v39 }
 0x8c2   : > { %v1130_v42 = vadd.f32 %v1129_v41, %v1121_v35 }
 0x8c4   : > { %v1131_v43 = vmul.f32 0.7978846, %v1130_v42 }
 0x8c6   : > { %1579 = vtanh.f32 %v1131_v43 }
 0x8d3   : > { %v1580_v44 = vpop.eup %1579 }
 0x8d4   : > { %v1133_v45 = vadd.f32 1.0, %v1580_v44 }
 0x8d6   : > { %v1134_v46 = vmul.f32 %v1133_v45, %v1126_v8 }
 0x8d8   : > { %v1135_v47 = vpack.c.bf16 %v1134_v46, %v1134_v46 }
 0x8da   : > { %1487 = vmatmul.mubr.bf16.vlgmr.msra.gmra.mxu1 %v1135_v47 }
 0x99a   : > { %v1241_v49 = vpop.f32.mrf.mxu1 }
 0x99b   : > { %v1242_v50 = vadd.f32 %v1351_v48, %v1241_v49 }
 0x99c   : > { %v1488_v51 = vpop.f32.mrf.mxu1 }
 0x99d   : > { %v1247_v52 = vadd.f32 %v1242_v50, %v1885_v4 }
 0x99e   : > { %v1244_v53 = vpop.f32.mrf.mxu1 }
 0x99f   : > { %1248 = vst.msk [vmem:[%s404_s16] sm:$0xff] %vm413_vm0, %v1247_v52 }
 0x9a0   : > { %v1489_v54 = vpop.f32.mrf.mxu1 }
 0x9a1   : > { %1594 = shalt.err (!%p1591_p3)
}
 0x9a2   : > { %s1595_s16 = scalar_lea.hbm %s1948_s0, 128  ;;  %s1599_s19 = scalar_lea.hbm %s2002_s12, 256 }
 0x9a3   : > { %p1596_p4 = scmp.ne.s32.totalorder %s1948_s0, %s1595_s16  ;;  %p1600_p9 = scmp.lt.s32.totalorder %s1948_s0, %s2002_s12 }
 0x9a4   : > { %p1601_p10 = scmp.lt.s32.totalorder %s1599_s19, %s1595_s16 }
 0x9a5   : > { %p1597_p7 = pnand %p1596_p4, %p1763_p5 }
 0x9a6   : > { %p1602_p11 = por %p1601_p10, %p1600_p9 }
 0x9a7   : > { %p1598_p8 = pneg %p1597_p7 }
 0x9a9   : > { %p1603_p12 = pnand %p1602_p11, %p1598_p8 }
 0x9ab   : > { %1606 = shalt.err (!%p1603_p12)
}
 0x9ac   : > { %1490 = dma.vmem_to_hbm [thread:$0]  (%p1763_p5), %s1950_s17, 128, %s1948_s0, %s1250_s25  }
 0x9ad PF: > { %p1496_p13 = scmp.ge.s32.totalorder %s1641_s24, 2  ;;  %s1275_s26 = sand.u32 1, %s1629_s21  }
 0x9ae   : > { %s1276_s1 = scalar_lea.sflag [#allocation3], %s1275_s26 }
 0x9af   : > { %p1493_p0 = pnand %p1496_p13, %p1767_p6 }
 0x9b1   : > { %p1494_p1 = pneg %p1493_p0 }
 0x9b3   : > { %1624 = dma.done.wait (%p1494_p1), %s1276_s1, 128  }
 0x9b4   : > { %1626 = vsyncadd (%p1494_p1), %s1276_s1, 4294967168  ;;  %p22_p2 = scmp.ge.s32.totalorder %s1750_s27, 4   ;;  %s2009_s21 = smov %s1633_s22 }
 0x9b5   : > { %s2010_s22 = smov %s1637_s23  ;;  %s2011_s23 = smov %s1761_s30 }
 0x9b6   : > { %s2012_s24 = smov %s1750_s27  ;;  %24 = sbr.rel (!%p22_p2) target bundleno = 6 (0x6), region = 103 }
 0x9bb   :  { %1281 = vsyncpa [#allocation3], 1 }
 0x9bc   :  { %1283 = vsyncpa [#allocation3 + $0x1], 1 }

</bundles_post_ra>
